<compile_context>
chip_gen: v5e
topology: v5e:2x2
jax: 0.10.0
libtpu: 0.0.40
codegen_flags: <defaults>
</compile_context>

<pallas_src>
import math

import jax
import jax.numpy as jnp
from jax.experimental import pallas as pl
from jax.experimental.pallas import tpu as pltpu


def _layernorm(x, gamma, beta, eps=1e-6):
    # TODO(synk): reference uses a custom LayerNorm class (not shown); assuming
    # standard mean / biased-variance normalization with eps=1e-6.
    mu = jnp.mean(x, axis=-1, keepdims=True)
    var = jnp.mean((x - mu) ** 2, axis=-1, keepdims=True)
    return (x - mu) * jax.lax.rsqrt(var + eps) * gamma + beta


def encoder_layer_kernel(
    x_ref, mb_ref,
    wq_ref, bq_ref, wk_ref, bk_ref, wv_ref, bv_ref, wo_ref, bo_ref,
    g1_ref, be1_ref, w1_ref, b1_ref, w2_ref, b2_ref, g2_ref, be2_ref,
    o_ref,
):
    x = x_ref[0].astype(jnp.float32)          # [S, D]
    mbias = mb_ref[...]                       # [1, 1, S] additive mask bias
    H = wq_ref.shape[0]
    S, D = x.shape

    bf16 = jnp.bfloat16
    x_bf = x.astype(bf16)
    xb = jnp.broadcast_to(x_bf, (H, S, D))    # hoisted once, reused for Q/K/V

    # Head-batched Q/K/V projections (1/sqrt(dh) already folded into wq/bq).
    q = jnp.einsum('hsd,hde->hse', xb, wq_ref[...],
                   preferred_element_type=jnp.float32) + bq_ref[...]
    k = jnp.einsum('hsd,hde->hse', xb, wk_ref[...],
                   preferred_element_type=jnp.float32) + bk_ref[...]
    v = jnp.einsum('hsd,hde->hse', xb, wv_ref[...],
                   preferred_element_type=jnp.float32) + bv_ref[...]

    # Scaled-dot-product attention, batched over heads; transpose absorbed
    # into the dot_general contraction (no materialized k.T).
    scores = jnp.einsum('hqd,hkd->hqk', q.astype(bf16), k.astype(bf16),
                        preferred_element_type=jnp.float32)
    scores = scores + mbias                    # broadcast over heads & queries
    scores = scores - jnp.max(scores, axis=-1, keepdims=True)
    p = jnp.exp(scores)
    p = p * pl.reciprocal(jnp.sum(p, axis=-1, keepdims=True), approx=True)

    ctx = jnp.einsum('hqk,hkd->hqd', p.astype(bf16), v.astype(bf16),
                     preferred_element_type=jnp.float32)        # [H, S, dh]
    # Output projection: per-head matmul + sum over heads  (== concat @ Wo).
    attn = jnp.einsum('hsd,hdo->hso', ctx.astype(bf16), wo_ref[...],
                      preferred_element_type=jnp.float32)
    attn = jnp.sum(attn, axis=0) + bo_ref[...]                   # [S, D]

    # Residual + LayerNorm 1 (dropout = identity in inference).
    h1 = _layernorm(x + attn, g1_ref[...], be1_ref[...])

    # Position-wise feed-forward: Linear -> ReLU -> Linear (bf16 MXU, f32 acc).
    ff = jnp.dot(h1.astype(bf16), w1_ref[...],
                 preferred_element_type=jnp.float32) + b1_ref[...]
    ff = jnp.maximum(ff, 0.0)
    ff = jnp.dot(ff.astype(bf16), w2_ref[...],
                 preferred_element_type=jnp.float32) + b2_ref[...]

    # Residual + LayerNorm 2, then final ReLU (dropout = identity).
    h2 = _layernorm(h1 + ff, g2_ref[...], be2_ref[...])
    o_ref[0] = jnp.maximum(h2, 0.0).astype(o_ref.dtype)


_WEIGHT_ORDER = ("wq", "bq", "wk", "bk", "wv", "bv", "wo", "bo",
                 "g1", "be1", "w1", "b1", "w2", "b2", "g2", "be2")


def encoder_layer(x, mask_bias, packed, *, single_buffer_weights=True):
    B, S, D = x.shape
    weights = [packed[name] for name in _WEIGHT_ORDER]

    def const_spec(arr):
        shape = arr.shape
        n = len(shape)
        idx = lambda b: (0,) * n
        if single_buffer_weights:
            # Constant index_map across the grid: keep a single resident copy
            # instead of the default double buffer (halves weight VMEM).
            return pl.BlockSpec(shape, idx, pipeline_mode=pl.Buffered(1))
        return pl.BlockSpec(shape, idx)

    in_specs = [
        pl.BlockSpec((1, S, D), lambda b: (b, 0, 0)),   # x
        pl.BlockSpec((1, 1, S), lambda b: (b, 0, 0)),   # additive mask bias
    ] + [const_spec(w) for w in weights]

    # VMEM budget: weights (allow 2x in case of double-buffer fallback) + the
    # pipelined per-batch x/out/mask blocks + headroom, capped at v7x's 64 MiB.
    weight_bytes = sum(int(w.size) * w.dtype.itemsize for w in weights)
    block_bytes = 2 * S * D * x.dtype.itemsize + S * 4
    vmem_limit = min(64 * 1024 * 1024,
                     max(16 * 1024 * 1024,
                         2 * weight_bytes + 4 * block_bytes + 8 * 1024 * 1024))

    return pl.pallas_call(
        encoder_layer_kernel,
        out_shape=jax.ShapeDtypeStruct((B, S, D), x.dtype),
        grid_spec=pltpu.PrefetchScalarGridSpec(
            num_scalar_prefetch=0,
            grid=(B,),
            in_specs=in_specs,
            out_specs=pl.BlockSpec((1, S, D), lambda b: (b, 0, 0)),
        ),
        compiler_params=pltpu.CompilerParams(
            # Batch rows are independent -> shard across v7x's 2 TensorCores.
            dimension_semantics=("parallel",),
            vmem_limit_bytes=int(vmem_limit),
        ),
    )(x, mask_bias, *weights)


def init_layer_params(key, embed_dim, ff_hidden):
    # nn.Linear-equivalent parameters, stored as [in, out] (transposed).
    ks = jax.random.split(key, 12)

    def lin(kw, kb, din, dout):
        w = jax.random.normal(kw, (din, dout), jnp.float32) * (1.0 / math.sqrt(din))
        b = jax.random.normal(kb, (1, dout), jnp.float32) * 0.02
        return w, b

    wq, bq = lin(ks[0], ks[1], embed_dim, embed_dim)
    wk, bk = lin(ks[2], ks[3], embed_dim, embed_dim)
    wv, bv = lin(ks[4], ks[5], embed_dim, embed_dim)
    wo, bo = lin(ks[6], ks[7], embed_dim, embed_dim)
    w1, b1 = lin(ks[8], ks[9], embed_dim, ff_hidden)
    w2, b2 = lin(ks[10], ks[11], ff_hidden, embed_dim)
    ones = jnp.ones((1, embed_dim), jnp.float32)
    zeros = jnp.zeros((1, embed_dim), jnp.float32)
    return dict(wq=wq, bq=bq, wk=wk, bk=bk, wv=wv, bv=bv, wo=wo, bo=bo,
                g1=ones, be1=zeros, w1=w1, b1=b1, w2=w2, b2=b2,
                g2=ones, be2=zeros)


def pack_layer_params(p, n_heads, compute_dtype=jnp.bfloat16):
    """Host-side repack: split attention weights per head, fold the 1/sqrt(dh)
    score scale into the Q projection, and cast matmul weights to bf16 (f32
    accumulation in the kernel).  Biases / LayerNorm params stay f32."""
    D = p["wq"].shape[0]
    dh = D // n_heads
    scale = 1.0 / math.sqrt(dh)
    f32 = jnp.float32

    def split_w(w):                      # [D, D] -> [H, D, dh]
        return jnp.transpose(w.reshape(D, n_heads, dh), (1, 0, 2))

    def split_b(b):                      # [1, D] -> [H, 1, dh]
        return b.reshape(n_heads, dh)[:, None, :]

    return dict(
        wq=(split_w(p["wq"]) * scale).astype(compute_dtype),
        bq=(split_b(p["bq"]) * scale).astype(f32),
        wk=split_w(p["wk"]).astype(compute_dtype),
        bk=split_b(p["bk"]).astype(f32),
        wv=split_w(p["wv"]).astype(compute_dtype),
        bv=split_b(p["bv"]).astype(f32),
        wo=p["wo"].reshape(n_heads, dh, D).astype(compute_dtype),
        bo=p["bo"].astype(f32),
        g1=p["g1"].astype(f32), be1=p["be1"].astype(f32),
        w1=p["w1"].astype(compute_dtype), b1=p["b1"].astype(f32),
        w2=p["w2"].astype(compute_dtype), b2=p["b2"].astype(f32),
        g2=p["g2"].astype(f32), be2=p["be2"].astype(f32),
    )


def encoder_forward(inputs, inputs_mask, layer_params, *, n_heads):
    """Matches the reference Encoder.forward exactly: every layer reads the
    ORIGINAL `inputs` and only the last layer's output is returned, so the
    first N-1 layers are dead computation and are skipped here."""
    # inputs_mask [B, S] -> additive bias [B, 1, S] (mirrors mask[:, None, None, :]).
    mask_bias = jnp.where(inputs_mask[:, None, :] == 0, -1e9, 0.0).astype(jnp.float32)
    packed = pack_layer_params(layer_params[-1], n_heads)
    try:
        return encoder_layer(inputs, mask_bias, packed, single_buffer_weights=True)
    except Exception:
        # Fallback for JAX builds that reject single-buffered pipeline_mode:
        # default double-buffered weight blocks (correctness identical).
        return encoder_layer(inputs, mask_bias, packed, single_buffer_weights=False)


if __name__ == "__main__":
    B, S, D, H, F = 2, 8, 32, 4, 64
    N_LAYERS = 2

    key = jax.random.PRNGKey(0)
    k_x, k_p = jax.random.split(key)

    inputs = jax.random.normal(k_x, (B, S, D), jnp.float32)
    inputs_mask = jnp.array(
        [[1] * S, [1] * (S - 2) + [0, 0]], dtype=jnp.int32
    )  # second example has 2 padded positions

    layer_keys = jax.random.split(k_p, N_LAYERS)
    layer_params = [init_layer_params(k, D, F) for k in layer_keys]

    out = encoder_forward(inputs, inputs_mask, layer_params, n_heads=H)
    out = jax.block_until_ready(out)
    assert out.shape == (B, S, D)
    assert bool(jnp.all(jnp.isfinite(out)))
    print("KERNEL_OK")
</pallas_src>

<mosaic_0001>
module attributes {stable_mosaic.version = 11 : i64} {
  func.func @encoder_layer_kernel(%arg0: i32, %arg1: memref<1x8x32xf32, #tpu.memory_space<vmem>>, %arg2: memref<1x1x8xf32, #tpu.memory_space<vmem>>, %arg3: memref<4x32x8xbf16, #tpu.memory_space<vmem>>, %arg4: memref<4x1x8xf32, #tpu.memory_space<vmem>>, %arg5: memref<4x32x8xbf16, #tpu.memory_space<vmem>>, %arg6: memref<4x1x8xf32, #tpu.memory_space<vmem>>, %arg7: memref<4x32x8xbf16, #tpu.memory_space<vmem>>, %arg8: memref<4x1x8xf32, #tpu.memory_space<vmem>>, %arg9: memref<4x8x32xbf16, #tpu.memory_space<vmem>>, %arg10: memref<1x32xf32, #tpu.memory_space<vmem>>, %arg11: memref<1x32xf32, #tpu.memory_space<vmem>>, %arg12: memref<1x32xf32, #tpu.memory_space<vmem>>, %arg13: memref<32x64xbf16, #tpu.memory_space<vmem>>, %arg14: memref<1x64xf32, #tpu.memory_space<vmem>>, %arg15: memref<64x32xbf16, #tpu.memory_space<vmem>>, %arg16: memref<1x32xf32, #tpu.memory_space<vmem>>, %arg17: memref<1x32xf32, #tpu.memory_space<vmem>>, %arg18: memref<1x32xf32, #tpu.memory_space<vmem>>, %arg19: memref<1x8x32xf32, #tpu.memory_space<vmem>>) attributes {dimension_semantics = [#tpu.dimension_semantics<parallel>], iteration_bounds = array<i64: 2>, scalar_prefetch = 0 : i64, scratch_operands = 0 : i64, tpu.core_type = #tpu.core_type<tc>, window_params = [{transform_indices = @transform_0, window_bounds = array<i64: 1, 8, 32>}, {transform_indices = @transform_1, window_bounds = array<i64: 1, 1, 8>}, {pipeline_mode = #tpu.pipeline_mode<synchronous>, transform_indices = @transform_2, window_bounds = array<i64: 4, 32, 8>}, {pipeline_mode = #tpu.pipeline_mode<synchronous>, transform_indices = @transform_3, window_bounds = array<i64: 4, 1, 8>}, {pipeline_mode = #tpu.pipeline_mode<synchronous>, transform_indices = @transform_4, window_bounds = array<i64: 4, 32, 8>}, {pipeline_mode = #tpu.pipeline_mode<synchronous>, transform_indices = @transform_5, window_bounds = array<i64: 4, 1, 8>}, {pipeline_mode = #tpu.pipeline_mode<synchronous>, transform_indices = @transform_6, window_bounds = array<i64: 4, 32, 8>}, {pipeline_mode = #tpu.pipeline_mode<synchronous>, transform_indices = @transform_7, window_bounds = array<i64: 4, 1, 8>}, {pipeline_mode = #tpu.pipeline_mode<synchronous>, transform_indices = @transform_8, window_bounds = array<i64: 4, 8, 32>}, {pipeline_mode = #tpu.pipeline_mode<synchronous>, transform_indices = @transform_9, window_bounds = array<i64: 1, 32>}, {pipeline_mode = #tpu.pipeline_mode<synchronous>, transform_indices = @transform_10, window_bounds = array<i64: 1, 32>}, {pipeline_mode = #tpu.pipeline_mode<synchronous>, transform_indices = @transform_11, window_bounds = array<i64: 1, 32>}, {pipeline_mode = #tpu.pipeline_mode<synchronous>, transform_indices = @transform_12, window_bounds = array<i64: 32, 64>}, {pipeline_mode = #tpu.pipeline_mode<synchronous>, transform_indices = @transform_13, window_bounds = array<i64: 1, 64>}, {pipeline_mode = #tpu.pipeline_mode<synchronous>, transform_indices = @transform_14, window_bounds = array<i64: 64, 32>}, {pipeline_mode = #tpu.pipeline_mode<synchronous>, transform_indices = @transform_15, window_bounds = array<i64: 1, 32>}, {pipeline_mode = #tpu.pipeline_mode<synchronous>, transform_indices = @transform_16, window_bounds = array<i64: 1, 32>}, {pipeline_mode = #tpu.pipeline_mode<synchronous>, transform_indices = @transform_17, window_bounds = array<i64: 1, 32>}, {transform_indices = @transform_18, window_bounds = array<i64: 1, 8, 32>}]} {
    %c0 = arith.constant 0 : index
    %c0_0 = arith.constant 0 : index
    %c0_1 = arith.constant 0 : index
    %0 = vector.load %arg1[%c0, %c0_0, %c0_1] : memref<1x8x32xf32, #tpu.memory_space<vmem>>, vector<1x8x32xf32>
    %1 = vector.shape_cast %0 : vector<1x8x32xf32> to vector<8x32xf32>
    %c0_2 = arith.constant 0 : index
    %c0_3 = arith.constant 0 : index
    %c0_4 = arith.constant 0 : index
    %2 = vector.load %arg2[%c0_2, %c0_3, %c0_4] : memref<1x1x8xf32, #tpu.memory_space<vmem>>, vector<1x1x8xf32>
    %3 = arith.truncf %1 : vector<8x32xf32> to vector<8x32xbf16>
    %4 = vector.shape_cast %3 : vector<8x32xbf16> to vector<1x8x32xbf16>
    %5 = vector.broadcast %4 : vector<1x8x32xbf16> to vector<4x8x32xbf16>
    %c0_5 = arith.constant 0 : index
    %c0_6 = arith.constant 0 : index
    %c0_7 = arith.constant 0 : index
    %6 = vector.load %arg3[%c0_5, %c0_6, %c0_7] : memref<4x32x8xbf16, #tpu.memory_space<vmem>>, vector<4x32x8xbf16>
    "tpu.trace_start"() <{level = 10 : i32, message = "hsd,hde->hse"}> : () -> ()
    %cst = arith.constant dense<0.000000e+00> : vector<4x8x8xf32>
    %7 = tpu.matmul %5, %6, %cst {dimension_numbers = #tpu.dot_dimension_numbers<[2], [1], [1], [2], [0, 0, 0, 1, 1, 2], [0], [0]>} : vector<4x8x32xbf16>, vector<4x32x8xbf16>, vector<4x8x8xf32> -> vector<4x8x8xf32>
    "tpu.trace_stop"() : () -> ()
    %c0_8 = arith.constant 0 : index
    %c0_9 = arith.constant 0 : index
    %c0_10 = arith.constant 0 : index
    %8 = vector.load %arg4[%c0_8, %c0_9, %c0_10] : memref<4x1x8xf32, #tpu.memory_space<vmem>>, vector<4x1x8xf32>
    %9 = vector.broadcast %8 : vector<4x1x8xf32> to vector<4x8x8xf32>
    %10 = arith.addf %7, %9 : vector<4x8x8xf32>
    %c0_11 = arith.constant 0 : index
    %c0_12 = arith.constant 0 : index
    %c0_13 = arith.constant 0 : index
    %11 = vector.load %arg5[%c0_11, %c0_12, %c0_13] : memref<4x32x8xbf16, #tpu.memory_space<vmem>>, vector<4x32x8xbf16>
    "tpu.trace_start"() <{level = 10 : i32, message = "hsd,hde->hse"}> : () -> ()
    %cst_14 = arith.constant dense<0.000000e+00> : vector<4x8x8xf32>
    %12 = tpu.matmul %5, %11, %cst_14 {dimension_numbers = #tpu.dot_dimension_numbers<[2], [1], [1], [2], [0, 0, 0, 1, 1, 2], [0], [0]>} : vector<4x8x32xbf16>, vector<4x32x8xbf16>, vector<4x8x8xf32> -> vector<4x8x8xf32>
    "tpu.trace_stop"() : () -> ()
    %c0_15 = arith.constant 0 : index
    %c0_16 = arith.constant 0 : index
    %c0_17 = arith.constant 0 : index
    %13 = vector.load %arg6[%c0_15, %c0_16, %c0_17] : memref<4x1x8xf32, #tpu.memory_space<vmem>>, vector<4x1x8xf32>
    %14 = vector.broadcast %13 : vector<4x1x8xf32> to vector<4x8x8xf32>
    %15 = arith.addf %12, %14 : vector<4x8x8xf32>
    %c0_18 = arith.constant 0 : index
    %c0_19 = arith.constant 0 : index
    %c0_20 = arith.constant 0 : index
    %16 = vector.load %arg7[%c0_18, %c0_19, %c0_20] : memref<4x32x8xbf16, #tpu.memory_space<vmem>>, vector<4x32x8xbf16>
    "tpu.trace_start"() <{level = 10 : i32, message = "hsd,hde->hse"}> : () -> ()
    %cst_21 = arith.constant dense<0.000000e+00> : vector<4x8x8xf32>
    %17 = tpu.matmul %5, %16, %cst_21 {dimension_numbers = #tpu.dot_dimension_numbers<[2], [1], [1], [2], [0, 0, 0, 1, 1, 2], [0], [0]>} : vector<4x8x32xbf16>, vector<4x32x8xbf16>, vector<4x8x8xf32> -> vector<4x8x8xf32>
    "tpu.trace_stop"() : () -> ()
    %c0_22 = arith.constant 0 : index
    %c0_23 = arith.constant 0 : index
    %c0_24 = arith.constant 0 : index
    %18 = vector.load %arg8[%c0_22, %c0_23, %c0_24] : memref<4x1x8xf32, #tpu.memory_space<vmem>>, vector<4x1x8xf32>
    %19 = vector.broadcast %18 : vector<4x1x8xf32> to vector<4x8x8xf32>
    %20 = arith.addf %17, %19 : vector<4x8x8xf32>
    %21 = arith.truncf %10 : vector<4x8x8xf32> to vector<4x8x8xbf16>
    %22 = arith.truncf %15 : vector<4x8x8xf32> to vector<4x8x8xbf16>
    "tpu.trace_start"() <{level = 10 : i32, message = "hqd,hkd->hqk"}> : () -> ()
    %cst_25 = arith.constant dense<0.000000e+00> : vector<4x8x8xf32>
    %23 = tpu.matmul %21, %22, %cst_25 {dimension_numbers = #tpu.dot_dimension_numbers<[2], [2], [1], [1], [0, 0, 0, 1, 1, 1], [0], [0]>} : vector<4x8x8xbf16>, vector<4x8x8xbf16>, vector<4x8x8xf32> -> vector<4x8x8xf32>
    "tpu.trace_stop"() : () -> ()
    %24 = vector.broadcast %2 : vector<1x1x8xf32> to vector<4x8x8xf32>
    %25 = arith.addf %23, %24 : vector<4x8x8xf32>
    %cst_26 = arith.constant dense<0xFF800000> : vector<4x8xf32>
    %26 = vector.multi_reduction <maximumf>, %25, %cst_26 [2] : vector<4x8x8xf32> to vector<4x8xf32>
    %27 = vector.shape_cast %26 : vector<4x8xf32> to vector<4x8x1xf32>
    %28 = vector.broadcast %27 : vector<4x8x1xf32> to vector<4x8x8xf32>
    %29 = arith.subf %25, %28 : vector<4x8x8xf32>
    %30 = math.exp %29 : vector<4x8x8xf32>
    %cst_27 = arith.constant dense<0.000000e+00> : vector<4x8xf32>
    %31 = vector.multi_reduction <add>, %30, %cst_27 [2] : vector<4x8x8xf32> to vector<4x8xf32>
    %32 = vector.shape_cast %31 : vector<4x8xf32> to vector<4x8x1xf32>
    %33 = tpu.reciprocal %32 {approx = true} : vector<4x8x1xf32> -> vector<4x8x1xf32>
    %34 = vector.broadcast %33 : vector<4x8x1xf32> to vector<4x8x8xf32>
    %35 = arith.mulf %30, %34 : vector<4x8x8xf32>
    %36 = arith.truncf %35 : vector<4x8x8xf32> to vector<4x8x8xbf16>
    %37 = arith.truncf %20 : vector<4x8x8xf32> to vector<4x8x8xbf16>
    "tpu.trace_start"() <{level = 10 : i32, message = "hqk,hkd->hqd"}> : () -> ()
    %cst_28 = arith.constant dense<0.000000e+00> : vector<4x8x8xf32>
    %38 = tpu.matmul %36, %37, %cst_28 {dimension_numbers = #tpu.dot_dimension_numbers<[2], [1], [1], [2], [0, 0, 0, 1, 1, 2], [0], [0]>} : vector<4x8x8xbf16>, vector<4x8x8xbf16>, vector<4x8x8xf32> -> vector<4x8x8xf32>
    "tpu.trace_stop"() : () -> ()
    %39 = arith.truncf %38 : vector<4x8x8xf32> to vector<4x8x8xbf16>
    %c0_29 = arith.constant 0 : index
    %c0_30 = arith.constant 0 : index
    %c0_31 = arith.constant 0 : index
    %40 = vector.load %arg9[%c0_29, %c0_30, %c0_31] : memref<4x8x32xbf16, #tpu.memory_space<vmem>>, vector<4x8x32xbf16>
    "tpu.trace_start"() <{level = 10 : i32, message = "hsd,hdo->hso"}> : () -> ()
    %cst_32 = arith.constant dense<0.000000e+00> : vector<4x8x32xf32>
    %41 = tpu.matmul %39, %40, %cst_32 {dimension_numbers = #tpu.dot_dimension_numbers<[2], [1], [1], [2], [0, 0, 0, 1, 1, 2], [0], [0]>} : vector<4x8x8xbf16>, vector<4x8x32xbf16>, vector<4x8x32xf32> -> vector<4x8x32xf32>
    "tpu.trace_stop"() : () -> ()
    %cst_33 = arith.constant dense<0.000000e+00> : vector<8x32xf32>
    %42 = vector.multi_reduction <add>, %41, %cst_33 [0] : vector<4x8x32xf32> to vector<8x32xf32>
    %c0_34 = arith.constant 0 : index
    %c0_35 = arith.constant 0 : index
    %43 = vector.load %arg10[%c0_34, %c0_35] : memref<1x32xf32, #tpu.memory_space<vmem>>, vector<1x32xf32>
    %44 = vector.broadcast %43 : vector<1x32xf32> to vector<8x32xf32>
    %45 = arith.addf %42, %44 : vector<8x32xf32>
    %46 = arith.addf %1, %45 : vector<8x32xf32>
    %c0_36 = arith.constant 0 : index
    %c0_37 = arith.constant 0 : index
    %47 = vector.load %arg11[%c0_36, %c0_37] : memref<1x32xf32, #tpu.memory_space<vmem>>, vector<1x32xf32>
    %c0_38 = arith.constant 0 : index
    %c0_39 = arith.constant 0 : index
    %48 = vector.load %arg12[%c0_38, %c0_39] : memref<1x32xf32, #tpu.memory_space<vmem>>, vector<1x32xf32>
    %cst_40 = arith.constant dense<0.000000e+00> : vector<8xf32>
    %49 = vector.multi_reduction <add>, %46, %cst_40 [1] : vector<8x32xf32> to vector<8xf32>
    %50 = vector.shape_cast %49 : vector<8xf32> to vector<8x1xf32>
    %cst_41 = arith.constant 3.200000e+01 : f32
    %51 = vector.broadcast %cst_41 : f32 to vector<8x1xf32>
    %52 = arith.divf %50, %51 : vector<8x1xf32>
    %53 = vector.broadcast %52 : vector<8x1xf32> to vector<8x32xf32>
    %54 = arith.subf %46, %53 : vector<8x32xf32>
    %55 = arith.mulf %54, %54 : vector<8x32xf32>
    %cst_42 = arith.constant dense<0.000000e+00> : vector<8xf32>
    %56 = vector.multi_reduction <add>, %55, %cst_42 [1] : vector<8x32xf32> to vector<8xf32>
    %57 = vector.shape_cast %56 : vector<8xf32> to vector<8x1xf32>
    %cst_43 = arith.constant 3.200000e+01 : f32
    %58 = vector.broadcast %cst_43 : f32 to vector<8x1xf32>
    %59 = arith.divf %57, %58 : vector<8x1xf32>
    %60 = vector.broadcast %52 : vector<8x1xf32> to vector<8x32xf32>
    %61 = arith.subf %46, %60 : vector<8x32xf32>
    %cst_44 = arith.constant 9.99999997E-7 : f32
    %62 = vector.broadcast %cst_44 : f32 to vector<8x1xf32>
    %63 = arith.addf %59, %62 : vector<8x1xf32>
    %64 = math.rsqrt %63 : vector<8x1xf32>
    %65 = vector.broadcast %64 : vector<8x1xf32> to vector<8x32xf32>
    %66 = arith.mulf %61, %65 : vector<8x32xf32>
    %67 = vector.broadcast %47 : vector<1x32xf32> to vector<8x32xf32>
    %68 = arith.mulf %66, %67 : vector<8x32xf32>
    %69 = vector.broadcast %48 : vector<1x32xf32> to vector<8x32xf32>
    %70 = arith.addf %68, %69 : vector<8x32xf32>
    %71 = arith.truncf %70 : vector<8x32xf32> to vector<8x32xbf16>
    %c0_45 = arith.constant 0 : index
    %c0_46 = arith.constant 0 : index
    %72 = vector.load %arg13[%c0_45, %c0_46] : memref<32x64xbf16, #tpu.memory_space<vmem>>, vector<32x64xbf16>
    %cst_47 = arith.constant dense<0.000000e+00> : vector<8x64xf32>
    %73 = tpu.matmul %71, %72, %cst_47 {dimension_numbers = #tpu.dot_dimension_numbers<[1], [0], [0], [1], [0, 0, 1, 1], [], []>} : vector<8x32xbf16>, vector<32x64xbf16>, vector<8x64xf32> -> vector<8x64xf32>
    %c0_48 = arith.constant 0 : index
    %c0_49 = arith.constant 0 : index
    %74 = vector.load %arg14[%c0_48, %c0_49] : memref<1x64xf32, #tpu.memory_space<vmem>>, vector<1x64xf32>
    %75 = vector.broadcast %74 : vector<1x64xf32> to vector<8x64xf32>
    %76 = arith.addf %73, %75 : vector<8x64xf32>
    %cst_50 = arith.constant 0.000000e+00 : f32
    %77 = vector.broadcast %cst_50 : f32 to vector<8x64xf32>
    %78 = arith.maximumf %76, %77 : vector<8x64xf32>
    %79 = arith.truncf %78 : vector<8x64xf32> to vector<8x64xbf16>
    %c0_51 = arith.constant 0 : index
    %c0_52 = arith.constant 0 : index
    %80 = vector.load %arg15[%c0_51, %c0_52] : memref<64x32xbf16, #tpu.memory_space<vmem>>, vector<64x32xbf16>
    %cst_53 = arith.constant dense<0.000000e+00> : vector<8x32xf32>
    %81 = tpu.matmul %79, %80, %cst_53 {dimension_numbers = #tpu.dot_dimension_numbers<[1], [0], [0], [1], [0, 0, 1, 1], [], []>} : vector<8x64xbf16>, vector<64x32xbf16>, vector<8x32xf32> -> vector<8x32xf32>
    %c0_54 = arith.constant 0 : index
    %c0_55 = arith.constant 0 : index
    %82 = vector.load %arg16[%c0_54, %c0_55] : memref<1x32xf32, #tpu.memory_space<vmem>>, vector<1x32xf32>
    %83 = vector.broadcast %82 : vector<1x32xf32> to vector<8x32xf32>
    %84 = arith.addf %81, %83 : vector<8x32xf32>
    %85 = arith.addf %70, %84 : vector<8x32xf32>
    %c0_56 = arith.constant 0 : index
    %c0_57 = arith.constant 0 : index
    %86 = vector.load %arg17[%c0_56, %c0_57] : memref<1x32xf32, #tpu.memory_space<vmem>>, vector<1x32xf32>
    %c0_58 = arith.constant 0 : index
    %c0_59 = arith.constant 0 : index
    %87 = vector.load %arg18[%c0_58, %c0_59] : memref<1x32xf32, #tpu.memory_space<vmem>>, vector<1x32xf32>
    %cst_60 = arith.constant dense<0.000000e+00> : vector<8xf32>
    %88 = vector.multi_reduction <add>, %85, %cst_60 [1] : vector<8x32xf32> to vector<8xf32>
    %89 = vector.shape_cast %88 : vector<8xf32> to vector<8x1xf32>
    %cst_61 = arith.constant 3.200000e+01 : f32
    %90 = vector.broadcast %cst_61 : f32 to vector<8x1xf32>
    %91 = arith.divf %89, %90 : vector<8x1xf32>
    %92 = vector.broadcast %91 : vector<8x1xf32> to vector<8x32xf32>
    %93 = arith.subf %85, %92 : vector<8x32xf32>
    %94 = arith.mulf %93, %93 : vector<8x32xf32>
    %cst_62 = arith.constant dense<0.000000e+00> : vector<8xf32>
    %95 = vector.multi_reduction <add>, %94, %cst_62 [1] : vector<8x32xf32> to vector<8xf32>
    %96 = vector.shape_cast %95 : vector<8xf32> to vector<8x1xf32>
    %cst_63 = arith.constant 3.200000e+01 : f32
    %97 = vector.broadcast %cst_63 : f32 to vector<8x1xf32>
    %98 = arith.divf %96, %97 : vector<8x1xf32>
    %99 = vector.broadcast %91 : vector<8x1xf32> to vector<8x32xf32>
    %100 = arith.subf %85, %99 : vector<8x32xf32>
    %cst_64 = arith.constant 9.99999997E-7 : f32
    %101 = vector.broadcast %cst_64 : f32 to vector<8x1xf32>
    %102 = arith.addf %98, %101 : vector<8x1xf32>
    %103 = math.rsqrt %102 : vector<8x1xf32>
    %104 = vector.broadcast %103 : vector<8x1xf32> to vector<8x32xf32>
    %105 = arith.mulf %100, %104 : vector<8x32xf32>
    %106 = vector.broadcast %86 : vector<1x32xf32> to vector<8x32xf32>
    %107 = arith.mulf %105, %106 : vector<8x32xf32>
    %108 = vector.broadcast %87 : vector<1x32xf32> to vector<8x32xf32>
    %109 = arith.addf %107, %108 : vector<8x32xf32>
    %cst_65 = arith.constant 0.000000e+00 : f32
    %110 = vector.broadcast %cst_65 : f32 to vector<8x32xf32>
    %111 = arith.maximumf %109, %110 : vector<8x32xf32>
    %c0_66 = arith.constant 0 : index
    %c0_67 = arith.constant 0 : index
    %c0_68 = arith.constant 0 : index
    %112 = vector.load %arg19[%c0_66, %c0_67, %c0_68] : memref<1x8x32xf32, #tpu.memory_space<vmem>>, vector<1x8x32xf32>
    %113 = vector.shape_cast %112 : vector<1x8x32xf32> to vector<8x32xf32>
    %114 = vector.shape_cast %111 : vector<8x32xf32> to vector<1x8x32xf32>
    tpu.vector_store %arg19[%c0_66, %c0_67, %c0_68], %114 {strides = array<i32>} : memref<1x8x32xf32, #tpu.memory_space<vmem>>, vector<1x8x32xf32>,
    return
  }
  func.func @transform_0(%arg0: i32) -> (i32, i32, i32) {
    %c0_i32 = arith.constant 0 : i32
    %c0_i32_0 = arith.constant 0 : i32
    %c0_i32_1 = arith.constant 0 : i32
    return %arg0, %c0_i32, %c0_i32_0 : i32, i32, i32
  }
  func.func @transform_1(%arg0: i32) -> (i32, i32, i32) {
    %c0_i32 = arith.constant 0 : i32
    %c0_i32_0 = arith.constant 0 : i32
    %c0_i32_1 = arith.constant 0 : i32
    return %arg0, %c0_i32, %c0_i32_0 : i32, i32, i32
  }
  func.func @transform_2(%arg0: i32) -> (i32, i32, i32) {
    %c0_i32 = arith.constant 0 : i32
    %c0_i32_0 = arith.constant 0 : i32
    %c0_i32_1 = arith.constant 0 : i32
    %c0_i32_2 = arith.constant 0 : i32
    return %c0_i32, %c0_i32_0, %c0_i32_1 : i32, i32, i32
  }
  func.func @transform_3(%arg0: i32) -> (i32, i32, i32) {
    %c0_i32 = arith.constant 0 : i32
    %c0_i32_0 = arith.constant 0 : i32
    %c0_i32_1 = arith.constant 0 : i32
    %c0_i32_2 = arith.constant 0 : i32
    return %c0_i32, %c0_i32_0, %c0_i32_1 : i32, i32, i32
  }
  func.func @transform_4(%arg0: i32) -> (i32, i32, i32) {
    %c0_i32 = arith.constant 0 : i32
    %c0_i32_0 = arith.constant 0 : i32
    %c0_i32_1 = arith.constant 0 : i32
    %c0_i32_2 = arith.constant 0 : i32
    return %c0_i32, %c0_i32_0, %c0_i32_1 : i32, i32, i32
  }
  func.func @transform_5(%arg0: i32) -> (i32, i32, i32) {
    %c0_i32 = arith.constant 0 : i32
    %c0_i32_0 = arith.constant 0 : i32
    %c0_i32_1 = arith.constant 0 : i32
    %c0_i32_2 = arith.constant 0 : i32
    return %c0_i32, %c0_i32_0, %c0_i32_1 : i32, i32, i32
  }
  func.func @transform_6(%arg0: i32) -> (i32, i32, i32) {
    %c0_i32 = arith.constant 0 : i32
    %c0_i32_0 = arith.constant 0 : i32
    %c0_i32_1 = arith.constant 0 : i32
    %c0_i32_2 = arith.constant 0 : i32
    return %c0_i32, %c0_i32_0, %c0_i32_1 : i32, i32, i32
  }
  func.func @transform_7(%arg0: i32) -> (i32, i32, i32) {
    %c0_i32 = arith.constant 0 : i32
    %c0_i32_0 = arith.constant 0 : i32
    %c0_i32_1 = arith.constant 0 : i32
    %c0_i32_2 = arith.constant 0 : i32
    return %c0_i32, %c0_i32_0, %c0_i32_1 : i32, i32, i32
  }
  func.func @transform_8(%arg0: i32) -> (i32, i32, i32) {
    %c0_i32 = arith.constant 0 : i32
    %c0_i32_0 = arith.constant 0 : i32
    %c0_i32_1 = arith.constant 0 : i32
    %c0_i32_2 = arith.constant 0 : i32
    return %c0_i32, %c0_i32_0, %c0_i32_1 : i32, i32, i32
  }
  func.func @transform_9(%arg0: i32) -> (i32, i32) {
    %c0_i32 = arith.constant 0 : i32
    %c0_i32_0 = arith.constant 0 : i32
    %c0_i32_1 = arith.constant 0 : i32
    return %c0_i32, %c0_i32_0 : i32, i32
  }
  func.func @transform_10(%arg0: i32) -> (i32, i32) {
    %c0_i32 = arith.constant 0 : i32
    %c0_i32_0 = arith.constant 0 : i32
    %c0_i32_1 = arith.constant 0 : i32
    return %c0_i32, %c0_i32_0 : i32, i32
  }
  func.func @transform_11(%arg0: i32) -> (i32, i32) {
    %c0_i32 = arith.constant 0 : i32
    %c0_i32_0 = arith.constant 0 : i32
    %c0_i32_1 = arith.constant 0 : i32
    return %c0_i32, %c0_i32_0 : i32, i32
  }
  func.func @transform_12(%arg0: i32) -> (i32, i32) {
    %c0_i32 = arith.constant 0 : i32
    %c0_i32_0 = arith.constant 0 : i32
    %c0_i32_1 = arith.constant 0 : i32
    return %c0_i32, %c0_i32_0 : i32, i32
  }
  func.func @transform_13(%arg0: i32) -> (i32, i32) {
    %c0_i32 = arith.constant 0 : i32
    %c0_i32_0 = arith.constant 0 : i32
    %c0_i32_1 = arith.constant 0 : i32
    return %c0_i32, %c0_i32_0 : i32, i32
  }
  func.func @transform_14(%arg0: i32) -> (i32, i32) {
    %c0_i32 = arith.constant 0 : i32
    %c0_i32_0 = arith.constant 0 : i32
    %c0_i32_1 = arith.constant 0 : i32
    return %c0_i32, %c0_i32_0 : i32, i32
  }
  func.func @transform_15(%arg0: i32) -> (i32, i32) {
    %c0_i32 = arith.constant 0 : i32
    %c0_i32_0 = arith.constant 0 : i32
    %c0_i32_1 = arith.constant 0 : i32
    return %c0_i32, %c0_i32_0 : i32, i32
  }
  func.func @transform_16(%arg0: i32) -> (i32, i32) {
    %c0_i32 = arith.constant 0 : i32
    %c0_i32_0 = arith.constant 0 : i32
    %c0_i32_1 = arith.constant 0 : i32
    return %c0_i32, %c0_i32_0 : i32, i32
  }
  func.func @transform_17(%arg0: i32) -> (i32, i32) {
    %c0_i32 = arith.constant 0 : i32
    %c0_i32_0 = arith.constant 0 : i32
    %c0_i32_1 = arith.constant 0 : i32
    return %c0_i32, %c0_i32_0 : i32, i32
  }
  func.func @transform_18(%arg0: i32) -> (i32, i32, i32) {
    %c0_i32 = arith.constant 0 : i32
    %c0_i32_0 = arith.constant 0 : i32
    %c0_i32_1 = arith.constant 0 : i32
    return %arg0, %c0_i32, %c0_i32_0 : i32, i32, i32
  }
}

module attributes {stable_mosaic.version = 11 : i64} {
  func.func @encoder_layer_kernel(%arg0: i32, %arg1: memref<1x8x32xf32, #tpu.memory_space<vmem>>, %arg2: memref<1x1x8xf32, #tpu.memory_space<vmem>>, %arg3: memref<4x32x8xbf16, #tpu.memory_space<vmem>>, %arg4: memref<4x1x8xf32, #tpu.memory_space<vmem>>, %arg5: memref<4x32x8xbf16, #tpu.memory_space<vmem>>, %arg6: memref<4x1x8xf32, #tpu.memory_space<vmem>>, %arg7: memref<4x32x8xbf16, #tpu.memory_space<vmem>>, %arg8: memref<4x1x8xf32, #tpu.memory_space<vmem>>, %arg9: memref<4x8x32xbf16, #tpu.memory_space<vmem>>, %arg10: memref<1x32xf32, #tpu.memory_space<vmem>>, %arg11: memref<1x32xf32, #tpu.memory_space<vmem>>, %arg12: memref<1x32xf32, #tpu.memory_space<vmem>>, %arg13: memref<32x64xbf16, #tpu.memory_space<vmem>>, %arg14: memref<1x64xf32, #tpu.memory_space<vmem>>, %arg15: memref<64x32xbf16, #tpu.memory_space<vmem>>, %arg16: memref<1x32xf32, #tpu.memory_space<vmem>>, %arg17: memref<1x32xf32, #tpu.memory_space<vmem>>, %arg18: memref<1x32xf32, #tpu.memory_space<vmem>>, %arg19: memref<1x8x32xf32, #tpu.memory_space<vmem>>) attributes {dimension_semantics = [#tpu.dimension_semantics<parallel>], iteration_bounds = array<i64: 2>, scalar_prefetch = 0 : i64, scratch_operands = 0 : i64, tpu.core_type = #tpu.core_type<tc>, window_params = [{transform_indices = @transform_0, window_bounds = array<i64: 1, 8, 32>}, {transform_indices = @transform_1, window_bounds = array<i64: 1, 1, 8>}, {pipeline_mode = #tpu.pipeline_mode<synchronous>, transform_indices = @transform_2, window_bounds = array<i64: 4, 32, 8>}, {pipeline_mode = #tpu.pipeline_mode<synchronous>, transform_indices = @transform_3, window_bounds = array<i64: 4, 1, 8>}, {pipeline_mode = #tpu.pipeline_mode<synchronous>, transform_indices = @transform_4, window_bounds = array<i64: 4, 32, 8>}, {pipeline_mode = #tpu.pipeline_mode<synchronous>, transform_indices = @transform_5, window_bounds = array<i64: 4, 1, 8>}, {pipeline_mode = #tpu.pipeline_mode<synchronous>, transform_indices = @transform_6, window_bounds = array<i64: 4, 32, 8>}, {pipeline_mode = #tpu.pipeline_mode<synchronous>, transform_indices = @transform_7, window_bounds = array<i64: 4, 1, 8>}, {pipeline_mode = #tpu.pipeline_mode<synchronous>, transform_indices = @transform_8, window_bounds = array<i64: 4, 8, 32>}, {pipeline_mode = #tpu.pipeline_mode<synchronous>, transform_indices = @transform_9, window_bounds = array<i64: 1, 32>}, {pipeline_mode = #tpu.pipeline_mode<synchronous>, transform_indices = @transform_10, window_bounds = array<i64: 1, 32>}, {pipeline_mode = #tpu.pipeline_mode<synchronous>, transform_indices = @transform_11, window_bounds = array<i64: 1, 32>}, {pipeline_mode = #tpu.pipeline_mode<synchronous>, transform_indices = @transform_12, window_bounds = array<i64: 32, 64>}, {pipeline_mode = #tpu.pipeline_mode<synchronous>, transform_indices = @transform_13, window_bounds = array<i64: 1, 64>}, {pipeline_mode = #tpu.pipeline_mode<synchronous>, transform_indices = @transform_14, window_bounds = array<i64: 64, 32>}, {pipeline_mode = #tpu.pipeline_mode<synchronous>, transform_indices = @transform_15, window_bounds = array<i64: 1, 32>}, {pipeline_mode = #tpu.pipeline_mode<synchronous>, transform_indices = @transform_16, window_bounds = array<i64: 1, 32>}, {pipeline_mode = #tpu.pipeline_mode<synchronous>, transform_indices = @transform_17, window_bounds = array<i64: 1, 32>}, {transform_indices = @transform_18, window_bounds = array<i64: 1, 8, 32>}]} {
    %c0 = arith.constant 0 : index
    %c0_0 = arith.constant 0 : index
    %c0_1 = arith.constant 0 : index
    %0 = vector.load %arg1[%c0, %c0_0, %c0_1] : memref<1x8x32xf32, #tpu.memory_space<vmem>>, vector<1x8x32xf32>
    %1 = vector.shape_cast %0 : vector<1x8x32xf32> to vector<8x32xf32>
    %c0_2 = arith.constant 0 : index
    %c0_3 = arith.constant 0 : index
    %c0_4 = arith.constant 0 : index
    %2 = vector.load %arg2[%c0_2, %c0_3, %c0_4] : memref<1x1x8xf32, #tpu.memory_space<vmem>>, vector<1x1x8xf32>
    %3 = arith.truncf %1 : vector<8x32xf32> to vector<8x32xbf16>
    %4 = vector.shape_cast %3 : vector<8x32xbf16> to vector<1x8x32xbf16>
    %5 = vector.broadcast %4 : vector<1x8x32xbf16> to vector<4x8x32xbf16>
    %c0_5 = arith.constant 0 : index
    %c0_6 = arith.constant 0 : index
    %c0_7 = arith.constant 0 : index
    %6 = vector.load %arg3[%c0_5, %c0_6, %c0_7] : memref<4x32x8xbf16, #tpu.memory_space<vmem>>, vector<4x32x8xbf16>
    "tpu.trace_start"() <{level = 10 : i32, message = "hsd,hde->hse"}> : () -> ()
    %cst = arith.constant dense<0.000000e+00> : vector<4x8x8xf32>
    %7 = tpu.matmul %5, %6, %cst {dimension_numbers = #tpu.dot_dimension_numbers<[2], [1], [1], [2], [0, 0, 0, 1, 1, 2], [0], [0]>} : vector<4x8x32xbf16>, vector<4x32x8xbf16>, vector<4x8x8xf32> -> vector<4x8x8xf32>
    "tpu.trace_stop"() : () -> ()
    %c0_8 = arith.constant 0 : index
    %c0_9 = arith.constant 0 : index
    %c0_10 = arith.constant 0 : index
    %8 = vector.load %arg4[%c0_8, %c0_9, %c0_10] : memref<4x1x8xf32, #tpu.memory_space<vmem>>, vector<4x1x8xf32>
    %9 = vector.broadcast %8 : vector<4x1x8xf32> to vector<4x8x8xf32>
    %10 = arith.addf %7, %9 : vector<4x8x8xf32>
    %c0_11 = arith.constant 0 : index
    %c0_12 = arith.constant 0 : index
    %c0_13 = arith.constant 0 : index
    %11 = vector.load %arg5[%c0_11, %c0_12, %c0_13] : memref<4x32x8xbf16, #tpu.memory_space<vmem>>, vector<4x32x8xbf16>
    "tpu.trace_start"() <{level = 10 : i32, message = "hsd,hde->hse"}> : () -> ()
    %cst_14 = arith.constant dense<0.000000e+00> : vector<4x8x8xf32>
    %12 = tpu.matmul %5, %11, %cst_14 {dimension_numbers = #tpu.dot_dimension_numbers<[2], [1], [1], [2], [0, 0, 0, 1, 1, 2], [0], [0]>} : vector<4x8x32xbf16>, vector<4x32x8xbf16>, vector<4x8x8xf32> -> vector<4x8x8xf32>
    "tpu.trace_stop"() : () -> ()
    %c0_15 = arith.constant 0 : index
    %c0_16 = arith.constant 0 : index
    %c0_17 = arith.constant 0 : index
    %13 = vector.load %arg6[%c0_15, %c0_16, %c0_17] : memref<4x1x8xf32, #tpu.memory_space<vmem>>, vector<4x1x8xf32>
    %14 = vector.broadcast %13 : vector<4x1x8xf32> to vector<4x8x8xf32>
    %15 = arith.addf %12, %14 : vector<4x8x8xf32>
    %c0_18 = arith.constant 0 : index
    %c0_19 = arith.constant 0 : index
    %c0_20 = arith.constant 0 : index
    %16 = vector.load %arg7[%c0_18, %c0_19, %c0_20] : memref<4x32x8xbf16, #tpu.memory_space<vmem>>, vector<4x32x8xbf16>
    "tpu.trace_start"() <{level = 10 : i32, message = "hsd,hde->hse"}> : () -> ()
    %cst_21 = arith.constant dense<0.000000e+00> : vector<4x8x8xf32>
    %17 = tpu.matmul %5, %16, %cst_21 {dimension_numbers = #tpu.dot_dimension_numbers<[2], [1], [1], [2], [0, 0, 0, 1, 1, 2], [0], [0]>} : vector<4x8x32xbf16>, vector<4x32x8xbf16>, vector<4x8x8xf32> -> vector<4x8x8xf32>
    "tpu.trace_stop"() : () -> ()
    %c0_22 = arith.constant 0 : index
    %c0_23 = arith.constant 0 : index
    %c0_24 = arith.constant 0 : index
    %18 = vector.load %arg8[%c0_22, %c0_23, %c0_24] : memref<4x1x8xf32, #tpu.memory_space<vmem>>, vector<4x1x8xf32>
    %19 = vector.broadcast %18 : vector<4x1x8xf32> to vector<4x8x8xf32>
    %20 = arith.addf %17, %19 : vector<4x8x8xf32>
    %21 = arith.truncf %10 : vector<4x8x8xf32> to vector<4x8x8xbf16>
    %22 = arith.truncf %15 : vector<4x8x8xf32> to vector<4x8x8xbf16>
    "tpu.trace_start"() <{level = 10 : i32, message = "hqd,hkd->hqk"}> : () -> ()
    %cst_25 = arith.constant dense<0.000000e+00> : vector<4x8x8xf32>
    %23 = tpu.matmul %21, %22, %cst_25 {dimension_numbers = #tpu.dot_dimension_numbers<[2], [2], [1], [1], [0, 0, 0, 1, 1, 1], [0], [0]>} : vector<4x8x8xbf16>, vector<4x8x8xbf16>, vector<4x8x8xf32> -> vector<4x8x8xf32>
    "tpu.trace_stop"() : () -> ()
    %24 = vector.broadcast %2 : vector<1x1x8xf32> to vector<4x8x8xf32>
    %25 = arith.addf %23, %24 : vector<4x8x8xf32>
    %cst_26 = arith.constant dense<0xFF800000> : vector<4x8xf32>
    %26 = vector.multi_reduction <maximumf>, %25, %cst_26 [2] : vector<4x8x8xf32> to vector<4x8xf32>
    %27 = vector.shape_cast %26 : vector<4x8xf32> to vector<4x8x1xf32>
    %28 = vector.broadcast %27 : vector<4x8x1xf32> to vector<4x8x8xf32>
    %29 = arith.subf %25, %28 : vector<4x8x8xf32>
    %30 = math.exp %29 : vector<4x8x8xf32>
    %cst_27 = arith.constant dense<0.000000e+00> : vector<4x8xf32>
    %31 = vector.multi_reduction <add>, %30, %cst_27 [2] : vector<4x8x8xf32> to vector<4x8xf32>
    %32 = vector.shape_cast %31 : vector<4x8xf32> to vector<4x8x1xf32>
    %33 = tpu.reciprocal %32 {approx = true} : vector<4x8x1xf32> -> vector<4x8x1xf32>
    %34 = vector.broadcast %33 : vector<4x8x1xf32> to vector<4x8x8xf32>
    %35 = arith.mulf %30, %34 : vector<4x8x8xf32>
    %36 = arith.truncf %35 : vector<4x8x8xf32> to vector<4x8x8xbf16>
    %37 = arith.truncf %20 : vector<4x8x8xf32> to vector<4x8x8xbf16>
    "tpu.trace_start"() <{level = 10 : i32, message = "hqk,hkd->hqd"}> : () -> ()
    %cst_28 = arith.constant dense<0.000000e+00> : vector<4x8x8xf32>
    %38 = tpu.matmul %36, %37, %cst_28 {dimension_numbers = #tpu.dot_dimension_numbers<[2], [1], [1], [2], [0, 0, 0, 1, 1, 2], [0], [0]>} : vector<4x8x8xbf16>, vector<4x8x8xbf16>, vector<4x8x8xf32> -> vector<4x8x8xf32>
    "tpu.trace_stop"() : () -> ()
    %39 = arith.truncf %38 : vector<4x8x8xf32> to vector<4x8x8xbf16>
    %c0_29 = arith.constant 0 : index
    %c0_30 = arith.constant 0 : index
    %c0_31 = arith.constant 0 : index
    %40 = vector.load %arg9[%c0_29, %c0_30, %c0_31] : memref<4x8x32xbf16, #tpu.memory_space<vmem>>, vector<4x8x32xbf16>
    "tpu.trace_start"() <{level = 10 : i32, message = "hsd,hdo->hso"}> : () -> ()
    %cst_32 = arith.constant dense<0.000000e+00> : vector<4x8x32xf32>
    %41 = tpu.matmul %39, %40, %cst_32 {dimension_numbers = #tpu.dot_dimension_numbers<[2], [1], [1], [2], [0, 0, 0, 1, 1, 2], [0], [0]>} : vector<4x8x8xbf16>, vector<4x8x32xbf16>, vector<4x8x32xf32> -> vector<4x8x32xf32>
    "tpu.trace_stop"() : () -> ()
    %cst_33 = arith.constant dense<0.000000e+00> : vector<8x32xf32>
    %42 = vector.multi_reduction <add>, %41, %cst_33 [0] : vector<4x8x32xf32> to vector<8x32xf32>
    %c0_34 = arith.constant 0 : index
    %c0_35 = arith.constant 0 : index
    %43 = vector.load %arg10[%c0_34, %c0_35] : memref<1x32xf32, #tpu.memory_space<vmem>>, vector<1x32xf32>
    %44 = vector.broadcast %43 : vector<1x32xf32> to vector<8x32xf32>
    %45 = arith.addf %42, %44 : vector<8x32xf32>
    %46 = arith.addf %1, %45 : vector<8x32xf32>
    %c0_36 = arith.constant 0 : index
    %c0_37 = arith.constant 0 : index
    %47 = vector.load %arg11[%c0_36, %c0_37] : memref<1x32xf32, #tpu.memory_space<vmem>>, vector<1x32xf32>
    %c0_38 = arith.constant 0 : index
    %c0_39 = arith.constant 0 : index
    %48 = vector.load %arg12[%c0_38, %c0_39] : memref<1x32xf32, #tpu.memory_space<vmem>>, vector<1x32xf32>
    %cst_40 = arith.constant dense<0.000000e+00> : vector<8xf32>
    %49 = vector.multi_reduction <add>, %46, %cst_40 [1] : vector<8x32xf32> to vector<8xf32>
    %50 = vector.shape_cast %49 : vector<8xf32> to vector<8x1xf32>
    %cst_41 = arith.constant 3.200000e+01 : f32
    %51 = vector.broadcast %cst_41 : f32 to vector<8x1xf32>
    %52 = arith.divf %50, %51 : vector<8x1xf32>
    %53 = vector.broadcast %52 : vector<8x1xf32> to vector<8x32xf32>
    %54 = arith.subf %46, %53 : vector<8x32xf32>
    %55 = arith.mulf %54, %54 : vector<8x32xf32>
    %cst_42 = arith.constant dense<0.000000e+00> : vector<8xf32>
    %56 = vector.multi_reduction <add>, %55, %cst_42 [1] : vector<8x32xf32> to vector<8xf32>
    %57 = vector.shape_cast %56 : vector<8xf32> to vector<8x1xf32>
    %cst_43 = arith.constant 3.200000e+01 : f32
    %58 = vector.broadcast %cst_43 : f32 to vector<8x1xf32>
    %59 = arith.divf %57, %58 : vector<8x1xf32>
    %60 = vector.broadcast %52 : vector<8x1xf32> to vector<8x32xf32>
    %61 = arith.subf %46, %60 : vector<8x32xf32>
    %cst_44 = arith.constant 9.99999997E-7 : f32
    %62 = vector.broadcast %cst_44 : f32 to vector<8x1xf32>
    %63 = arith.addf %59, %62 : vector<8x1xf32>
    %64 = math.rsqrt %63 : vector<8x1xf32>
    %65 = vector.broadcast %64 : vector<8x1xf32> to vector<8x32xf32>
    %66 = arith.mulf %61, %65 : vector<8x32xf32>
    %67 = vector.broadcast %47 : vector<1x32xf32> to vector<8x32xf32>
    %68 = arith.mulf %66, %67 : vector<8x32xf32>
    %69 = vector.broadcast %48 : vector<1x32xf32> to vector<8x32xf32>
    %70 = arith.addf %68, %69 : vector<8x32xf32>
    %71 = arith.truncf %70 : vector<8x32xf32> to vector<8x32xbf16>
    %c0_45 = arith.constant 0 : index
    %c0_46 = arith.constant 0 : index
    %72 = vector.load %arg13[%c0_45, %c0_46] : memref<32x64xbf16, #tpu.memory_space<vmem>>, vector<32x64xbf16>
    %cst_47 = arith.constant dense<0.000000e+00> : vector<8x64xf32>
    %73 = tpu.matmul %71, %72, %cst_47 {dimension_numbers = #tpu.dot_dimension_numbers<[1], [0], [0], [1], [0, 0, 1, 1], [], []>} : vector<8x32xbf16>, vector<32x64xbf16>, vector<8x64xf32> -> vector<8x64xf32>
    %c0_48 = arith.constant 0 : index
    %c0_49 = arith.constant 0 : index
    %74 = vector.load %arg14[%c0_48, %c0_49] : memref<1x64xf32, #tpu.memory_space<vmem>>, vector<1x64xf32>
    %75 = vector.broadcast %74 : vector<1x64xf32> to vector<8x64xf32>
    %76 = arith.addf %73, %75 : vector<8x64xf32>
    %cst_50 = arith.constant 0.000000e+00 : f32
    %77 = vector.broadcast %cst_50 : f32 to vector<8x64xf32>
    %78 = arith.maximumf %76, %77 : vector<8x64xf32>
    %79 = arith.truncf %78 : vector<8x64xf32> to vector<8x64xbf16>
    %c0_51 = arith.constant 0 : index
    %c0_52 = arith.constant 0 : index
    %80 = vector.load %arg15[%c0_51, %c0_52] : memref<64x32xbf16, #tpu.memory_space<vmem>>, vector<64x32xbf16>
    %cst_53 = arith.constant dense<0.000000e+00> : vector<8x32xf32>
    %81 = tpu.matmul %79, %80, %cst_53 {dimension_numbers = #tpu.dot_dimension_numbers<[1], [0], [0], [1], [0, 0, 1, 1], [], []>} : vector<8x64xbf16>, vector<64x32xbf16>, vector<8x32xf32> -> vector<8x32xf32>
    %c0_54 = arith.constant 0 : index
    %c0_55 = arith.constant 0 : index
    %82 = vector.load %arg16[%c0_54, %c0_55] : memref<1x32xf32, #tpu.memory_space<vmem>>, vector<1x32xf32>
    %83 = vector.broadcast %82 : vector<1x32xf32> to vector<8x32xf32>
    %84 = arith.addf %81, %83 : vector<8x32xf32>
    %85 = arith.addf %70, %84 : vector<8x32xf32>
    %c0_56 = arith.constant 0 : index
    %c0_57 = arith.constant 0 : index
    %86 = vector.load %arg17[%c0_56, %c0_57] : memref<1x32xf32, #tpu.memory_space<vmem>>, vector<1x32xf32>
    %c0_58 = arith.constant 0 : index
    %c0_59 = arith.constant 0 : index
    %87 = vector.load %arg18[%c0_58, %c0_59] : memref<1x32xf32, #tpu.memory_space<vmem>>, vector<1x32xf32>
    %cst_60 = arith.constant dense<0.000000e+00> : vector<8xf32>
    %88 = vector.multi_reduction <add>, %85, %cst_60 [1] : vector<8x32xf32> to vector<8xf32>
    %89 = vector.shape_cast %88 : vector<8xf32> to vector<8x1xf32>
    %cst_61 = arith.constant 3.200000e+01 : f32
    %90 = vector.broadcast %cst_61 : f32 to vector<8x1xf32>
    %91 = arith.divf %89, %90 : vector<8x1xf32>
    %92 = vector.broadcast %91 : vector<8x1xf32> to vector<8x32xf32>
    %93 = arith.subf %85, %92 : vector<8x32xf32>
    %94 = arith.mulf %93, %93 : vector<8x32xf32>
    %cst_62 = arith.constant dense<0.000000e+00> : vector<8xf32>
    %95 = vector.multi_reduction <add>, %94, %cst_62 [1] : vector<8x32xf32> to vector<8xf32>
    %96 = vector.shape_cast %95 : vector<8xf32> to vector<8x1xf32>
    %cst_63 = arith.constant 3.200000e+01 : f32
    %97 = vector.broadcast %cst_63 : f32 to vector<8x1xf32>
    %98 = arith.divf %96, %97 : vector<8x1xf32>
    %99 = vector.broadcast %91 : vector<8x1xf32> to vector<8x32xf32>
    %100 = arith.subf %85, %99 : vector<8x32xf32>
    %cst_64 = arith.constant 9.99999997E-7 : f32
    %101 = vector.broadcast %cst_64 : f32 to vector<8x1xf32>
    %102 = arith.addf %98, %101 : vector<8x1xf32>
    %103 = math.rsqrt %102 : vector<8x1xf32>
    %104 = vector.broadcast %103 : vector<8x1xf32> to vector<8x32xf32>
    %105 = arith.mulf %100, %104 : vector<8x32xf32>
    %106 = vector.broadcast %86 : vector<1x32xf32> to vector<8x32xf32>
    %107 = arith.mulf %105, %106 : vector<8x32xf32>
    %108 = vector.broadcast %87 : vector<1x32xf32> to vector<8x32xf32>
    %109 = arith.addf %107, %108 : vector<8x32xf32>
    %cst_65 = arith.constant 0.000000e+00 : f32
    %110 = vector.broadcast %cst_65 : f32 to vector<8x32xf32>
    %111 = arith.maximumf %109, %110 : vector<8x32xf32>
    %c0_66 = arith.constant 0 : index
    %c0_67 = arith.constant 0 : index
    %c0_68 = arith.constant 0 : index
    %112 = vector.load %arg19[%c0_66, %c0_67, %c0_68] : memref<1x8x32xf32, #tpu.memory_space<vmem>>, vector<1x8x32xf32>
    %113 = vector.shape_cast %112 : vector<1x8x32xf32> to vector<8x32xf32>
    %114 = vector.shape_cast %111 : vector<8x32xf32> to vector<1x8x32xf32>
    tpu.vector_store %arg19[%c0_66, %c0_67, %c0_68], %114 {strides = array<i32>} : memref<1x8x32xf32, #tpu.memory_space<vmem>>, vector<1x8x32xf32>,
    return
  }
  func.func @transform_0(%arg0: i32) -> (i32, i32, i32) {
    %c0_i32 = arith.constant 0 : i32
    %c0_i32_0 = arith.constant 0 : i32
    %c0_i32_1 = arith.constant 0 : i32
    return %arg0, %c0_i32, %c0_i32_0 : i32, i32, i32
  }
  func.func @transform_1(%arg0: i32) -> (i32, i32, i32) {
    %c0_i32 = arith.constant 0 : i32
    %c0_i32_0 = arith.constant 0 : i32
    %c0_i32_1 = arith.constant 0 : i32
    return %arg0, %c0_i32, %c0_i32_0 : i32, i32, i32
  }
  func.func @transform_2(%arg0: i32) -> (i32, i32, i32) {
    %c0_i32 = arith.constant 0 : i32
    %c0_i32_0 = arith.constant 0 : i32
    %c0_i32_1 = arith.constant 0 : i32
    %c0_i32_2 = arith.constant 0 : i32
    return %c0_i32, %c0_i32_0, %c0_i32_1 : i32, i32, i32
  }
  func.func @transform_3(%arg0: i32) -> (i32, i32, i32) {
    %c0_i32 = arith.constant 0 : i32
    %c0_i32_0 = arith.constant 0 : i32
    %c0_i32_1 = arith.constant 0 : i32
    %c0_i32_2 = arith.constant 0 : i32
    return %c0_i32, %c0_i32_0, %c0_i32_1 : i32, i32, i32
  }
  func.func @transform_4(%arg0: i32) -> (i32, i32, i32) {
    %c0_i32 = arith.constant 0 : i32
    %c0_i32_0 = arith.constant 0 : i32
    %c0_i32_1 = arith.constant 0 : i32
    %c0_i32_2 = arith.constant 0 : i32
    return %c0_i32, %c0_i32_0, %c0_i32_1 : i32, i32, i32
  }
  func.func @transform_5(%arg0: i32) -> (i32, i32, i32) {
    %c0_i32 = arith.constant 0 : i32
    %c0_i32_0 = arith.constant 0 : i32
    %c0_i32_1 = arith.constant 0 : i32
    %c0_i32_2 = arith.constant 0 : i32
    return %c0_i32, %c0_i32_0, %c0_i32_1 : i32, i32, i32
  }
  func.func @transform_6(%arg0: i32) -> (i32, i32, i32) {
    %c0_i32 = arith.constant 0 : i32
    %c0_i32_0 = arith.constant 0 : i32
    %c0_i32_1 = arith.constant 0 : i32
    %c0_i32_2 = arith.constant 0 : i32
    return %c0_i32, %c0_i32_0, %c0_i32_1 : i32, i32, i32
  }
  func.func @transform_7(%arg0: i32) -> (i32, i32, i32) {
    %c0_i32 = arith.constant 0 : i32
    %c0_i32_0 = arith.constant 0 : i32
    %c0_i32_1 = arith.constant 0 : i32
    %c0_i32_2 = arith.constant 0 : i32
    return %c0_i32, %c0_i32_0, %c0_i32_1 : i32, i32, i32
  }
  func.func @transform_8(%arg0: i32) -> (i32, i32, i32) {
    %c0_i32 = arith.constant 0 : i32
    %c0_i32_0 = arith.constant 0 : i32
    %c0_i32_1 = arith.constant 0 : i32
    %c0_i32_2 = arith.constant 0 : i32
    return %c0_i32, %c0_i32_0, %c0_i32_1 : i32, i32, i32
  }
  func.func @transform_9(%arg0: i32) -> (i32, i32) {
    %c0_i32 = arith.constant 0 : i32
    %c0_i32_0 = arith.constant 0 : i32
    %c0_i32_1 = arith.constant 0 : i32
    return %c0_i32, %c0_i32_0 : i32, i32
  }
  func.func @transform_10(%arg0: i32) -> (i32, i32) {
    %c0_i32 = arith.constant 0 : i32
    %c0_i32_0 = arith.constant 0 : i32
    %c0_i32_1 = arith.constant 0 : i32
    return %c0_i32, %c0_i32_0 : i32, i32
  }
  func.func @transform_11(%arg0: i32) -> (i32, i32) {
    %c0_i32 = arith.constant 0 : i32
    %c0_i32_0 = arith.constant 0 : i32
    %c0_i32_1 = arith.constant 0 : i32
    return %c0_i32, %c0_i32_0 : i32, i32
  }
  func.func @transform_12(%arg0: i32) -> (i32, i32) {
    %c0_i32 = arith.constant 0 : i32
    %c0_i32_0 = arith.constant 0 : i32
    %c0_i32_1 = arith.constant 0 : i32
    return %c0_i32, %c0_i32_0 : i32, i32
  }
  func.func @transform_13(%arg0: i32) -> (i32, i32) {
    %c0_i32 = arith.constant 0 : i32
    %c0_i32_0 = arith.constant 0 : i32
    %c0_i32_1 = arith.constant 0 : i32
    return %c0_i32, %c0_i32_0 : i32, i32
  }
  func.func @transform_14(%arg0: i32) -> (i32, i32) {
    %c0_i32 = arith.constant 0 : i32
    %c0_i32_0 = arith.constant 0 : i32
    %c0_i32_1 = arith.constant 0 : i32
    return %c0_i32, %c0_i32_0 : i32, i32
  }
  func.func @transform_15(%arg0: i32) -> (i32, i32) {
    %c0_i32 = arith.constant 0 : i32
    %c0_i32_0 = arith.constant 0 : i32
    %c0_i32_1 = arith.constant 0 : i32
    return %c0_i32, %c0_i32_0 : i32, i32
  }
  func.func @transform_16(%arg0: i32) -> (i32, i32) {
    %c0_i32 = arith.constant 0 : i32
    %c0_i32_0 = arith.constant 0 : i32
    %c0_i32_1 = arith.constant 0 : i32
    return %c0_i32, %c0_i32_0 : i32, i32
  }
  func.func @transform_17(%arg0: i32) -> (i32, i32) {
    %c0_i32 = arith.constant 0 : i32
    %c0_i32_0 = arith.constant 0 : i32
    %c0_i32_1 = arith.constant 0 : i32
    return %c0_i32, %c0_i32_0 : i32, i32
  }
  func.func @transform_18(%arg0: i32) -> (i32, i32, i32) {
    %c0_i32 = arith.constant 0 : i32
    %c0_i32_0 = arith.constant 0 : i32
    %c0_i32_1 = arith.constant 0 : i32
    return %arg0, %c0_i32, %c0_i32_0 : i32, i32, i32
  }
}

</mosaic_0001>

<bundles_post_ra>
// kernel: tpu_custom_call.1
= control target key start
LH: loop header
LB: loop body
LE: loop exit
PB: predicated region body
PF: predicated region fallthrough
CT: control target
= control target key end

     0   :  { %s2296_s0 = inlined_call_operand.vmem [shape: f32[2,8,32], index: 0, kind: input, shape index: {}]   ;;  %s2297_s1 = inlined_call_operand.vmem [shape: f32[2,1,8], index: 1, kind: input, shape index: {}]   ;;  %s2298_s2 = inlined_call_operand.vmem [shape: bf16[4,32,8], index: 2, kind: input, shape index: {}]   ;;  %s2299_s3 = inlined_call_operand.vmem [shape: f32[4,1,8], index: 3, kind: input, shape index: {}]   ;;  %s2300_s4 = inlined_call_operand.vmem [shape: bf16[4,32,8], index: 4, kind: input, shape index: {}]   ;;  %s2301_s5 = inlined_call_operand.vmem [shape: f32[4,1,8], index: 5, kind: input, shape index: {}]   ;;  %s2302_s6 = inlined_call_operand.vmem [shape: bf16[4,32,8], index: 6, kind: input, shape index: {}]   ;;  %s2303_s7 = inlined_call_operand.vmem [shape: f32[4,1,8], index: 7, kind: input, shape index: {}]   ;;  %s2304_s8 = inlined_call_operand.vmem [shape: bf16[4,8,32], index: 8, kind: input, shape index: {}]   ;;  %s2305_s9 = inlined_call_operand.vmem [shape: f32[1,32], index: 9, kind: input, shape index: {}]   ;;  %s2306_s10 = inlined_call_operand.vmem [shape: f32[1,32], index: 10, kind: input, shape index: {}]   ;;  %s2307_s11 = inlined_call_operand.vmem [shape: f32[1,32], index: 11, kind: input, shape index: {}]   ;;  %s2308_s12 = inlined_call_operand.vmem [shape: bf16[32,64], index: 12, kind: input, shape index: {}]   ;;  %s2309_s13 = inlined_call_operand.vmem [shape: f32[1,64], index: 13, kind: input, shape index: {}]   ;;  %s2310_s14 = inlined_call_operand.vmem [shape: bf16[64,32], index: 14, kind: input, shape index: {}]   ;;  %s2311_s15 = inlined_call_operand.vmem [shape: f32[1,32], index: 15, kind: input, shape index: {}]   ;;  %s2312_s16 = inlined_call_operand.vmem [shape: f32[1,32], index: 16, kind: input, shape index: {}]   ;;  %s2313_s17 = inlined_call_operand.vmem [shape: f32[1,32], index: 17, kind: input, shape index: {}]   ;;  %s2314_s18 = inlined_call_operand.hbm [shape: f32[2,8,32], index: 18, kind: output, shape index: {}]  }
   0x1   :  { %2326 = sst [smem:[#allocation12_spill]] %s2296_s0 }
   0x2   :  { %2327 = sst [smem:[#allocation13_spill]] %s2297_s1 }
   0x3   :  { %2328 = sst [smem:[#allocation14_spill]] %s2298_s2 }
   0x4   :  { %2329 = sst [smem:[#allocation15_spill]] %s2299_s3 }
   0x5   :  { %2330 = sst [smem:[#allocation16_spill]] %s2300_s4 }
   0x6   :  { %2331 = sst [smem:[#allocation17_spill]] %s2312_s16 }
   0x7   :  { %2332 = sst [smem:[#allocation18_spill]] %s2313_s17 }
   0x8   :  { %2333 = sst [smem:[#allocation19_spill]] %s2314_s18 }
   0x9   :  { %23 = vsyncpa [#allocation3], 0 }
   0xa   :  { %25 = vsyncpa [#allocation3 + $0x1], 0  ;;  %s1981_s27 = smov 0   ;;  %s1983_s28 = smov 0  }
   0xb   :  { %s1985_s29 = smov 0   ;;  %s1987_s30 = smov 0  }
   0xc LB: > { %2334 = sst [smem:[#allocation5_spill]] %s1871_s27  ;;  %s2002_s0 = sadd.s32 4294967295, %s1883_s30   ;;  %s1883_s30 = sphi %s1987_s30, %s2355_s30   ;;  %s1879_s29 = sphi %s1985_s29, %s2357_s29   ;;  %s1875_s28 = sphi %s1983_s28, %s2359_s28   ;;  %s1871_s27 = sphi %s1981_s27, %s2358_s27  }
   0xd   : > { %2335 = sst [smem:[#allocation6_spill]] %s1879_s29  ;;  %s1553_s19 = sadd.s32 4294967294, %s1883_s30  }
   0xe   : > { %2336 = sst [smem:[#allocation7_spill]] %s1883_s30  ;;  %s2006_s1 = sadd.s32 1, %s1883_s30  }
   0xf   : > { %2337 = sst [smem:[#allocation8_spill]] %s2006_s1  ;;  %s426_s20 = sadd.s32 1, %s1879_s29 }
  0x10   : > { %s423_s21 = ssub.s32 %s1883_s30, %s2006_s1  ;;  %p436_p0 = scmp.ne.s32.totalorder %s1879_s29, %s1875_s28 }
  0x11   : > { %p424_p1 = scmp.eq.s32.totalorder %s423_s21, 0  ;;  %p437_p2 = scmp.eq.s32.totalorder %s2002_s0, 1 }
  0x12   : > { %p442_p3 = scmp.ne.s32.totalorder %s1875_s28, %s1871_s27  ;;  %p443_p4 = scmp.eq.s32.totalorder %s1553_s19, 1 }
  0x13   : > { %s2017_s22 = scalar_select %p424_p1, %s1879_s29, %s426_s20  }
  0x14   : > { %p2019_p5 = por %p437_p2, %p436_p0  ;;  %p2023_p6 = por %p443_p4, %p442_p3 }
  0x15   : > { %2338 = sst [smem:[#allocation9_spill]] %s2017_s22  ;;  %p1556_p7 = scmp.ge.s32.totalorder %s1883_s30, 1 }
  0x16   : > { %s2339_s2 = scalar_select %p2019_p5, 1, 0 }
  0x17   : > { %s2341_s23 = scalar_select %p2023_p6, 1, 0 }
  0x18   : > { %2340 = sst [smem:[#allocation10_spill]] %s2339_s2  ;;  %p522_p8 = scmp.lt.s32.totalorder %s1883_s30, 3 }
  0x19   : > { %2342 = sst [smem:[#allocation11_spill]] %s2341_s23 }
  0x1a   : > { %p523_p9 = pnand %p1556_p7, %p522_p8 }
  0x1b   : > { %s2343_s26 = sld [smem:[#allocation14_spill]] (!%p523_p9)  ;;  %p578_p10 = scmp.lt.s32.totalorder (!%p523_p9), %s2002_s0, 1 }
  0x1c   : > { %526 = sbr.rel (%p523_p9) target bundleno = 1679 (0x68f), region = 92  ;;  %s2344_s4 = sld [smem:[#allocation16_spill]] (!%p523_p9) }
  0x1d   : > { %s2345_s18 = sld [smem:[#allocation12_spill]] (!%p523_p9)  ;;  %s575_s24 = sand.u32 (!%p523_p9), 1, %s1875_s28  }
  0x1e   : > { %s2346_s20 = sld [smem:[#allocation13_spill]] (!%p523_p9)  ;;  %s1557_s30 = sshll.u32 (!%p523_p9), %s575_s24, 3 }
  0x1f   : > { %s2347_s3 = sld [smem:[#allocation15_spill]] (!%p523_p9)  ;;  %s1706_s16 = sshll.u32 (!%p523_p9), %s2002_s0, 3 }
  0x20   : > { %s2348_s2 = sld [smem:[#allocation17_spill]] (!%p523_p9) }
  0x21   : > { %v1710_v0 = vld [vmem:[%s2343_s26 + $0x8] sm:$0xff]  ;;  %v1712_v1 = vld [vmem:[%s2343_s26 + $0x18] sm:$0xff]  ;;  %v1709_v4 = vld [vmem:[%s2343_s26] sm:$0xff]  ;;  %s2049_s19 = scalar_select %p578_p10, %s2002_s0, 1  ;;  %vm633_vm0 = vcmask 261120   ;;  %vm1000_vm1 = vcmask 64512  }
  0x22   : > { %v1714_v2 = vld [vmem:[%s2343_s26 + $0x28] sm:$0xff]  ;;  %v1716_v3 = vld [vmem:[%s2343_s26 + $0x38] sm:$0xff]  ;;  %643 = vmatpush.bf16.msra.mxu0 %v1710_v0  ;;  %668 = vmatpush.bf16.msra.mxu1 %v1712_v1  ;;  %v1711_v5 = vld [vmem:[%s2343_s26 + $0x10] sm:$0xff]  ;;  %vm1132_vm2 = vcmask 1043456   ;;  %vm1417_vm7 = vcmask 523264   ;;  %s2349_s25 = sld [smem:[#allocation18_spill]] }
  0x23   : > { %693 = vmatpush.bf16.msra.mxu2 %v1714_v2  ;;  %718 = vmatpush.bf16.msra.mxu3 %v1716_v3  ;;  %v1713_v6 = vld [vmem:[%s2343_s26 + $0x20] sm:$0xff]  ;;  %v1715_v7 = vld [vmem:[%s2343_s26 + $0x30] sm:$0xff]  ;;  %s1558_s21 = sshll.u32 %s2049_s19, 3  ;;  %v1718_v8 = vld [vmem:[%s2344_s4 + $0x8] sm:$0xff]  ;;  %s2350_s23 = sld [smem:[#allocation19_spill]] }
  0x24   : > { %v1720_v9 = vld [vmem:[%s2344_s4 + $0x18] sm:$0xff]  ;;  %s581_s17 = scalar_lea.vmem %s2345_s18, %s1558_s21  ;;  %v1722_v10 = vld [vmem:[%s2344_s4 + $0x28] sm:$0xff]  ;;  %v1717_v13 = vld [vmem:[%s2344_s4] sm:$0xff]  ;;  %s584_s29 = scalar_lea.vmem %s2346_s20, %s2049_s19 }
  0x25   : > { %v1724_v11 = vld [vmem:[%s2344_s4 + $0x38] sm:$0xff]  ;;  %v2073_v12 = vld [vmem:[%s581_s17] sm:$0xff]  ;;  %v1719_v14 = vld [vmem:[%s2344_s4 + $0x10] sm:$0xff]  ;;  %s1470_s17 = scalar_lea.sflag [#allocation3], %s575_s24 }
  0x26   : > { %644 = vmatpush.bf16.msra.mxu0 %v1709_v4  ;;  %669 = vmatpush.bf16.msra.mxu1 %v1711_v5  ;;  %v588_v15 = vpack.c.bf16 %v2073_v12, %v2073_v12  ;;  %v1721_v16 = vld [vmem:[%s2344_s4 + $0x20] sm:$0xff]  ;;  %v1723_v17 = vld [vmem:[%s2344_s4 + $0x30] sm:$0xff]  ;;  %v1730_v18 = vld [vmem:[%s2302_s6 + $0x28] sm:$0xff] }
  0x27   : > { %694 = vmatpush.bf16.msra.mxu2 %v1713_v6  ;;  %719 = vmatpush.bf16.msra.mxu3 %v1715_v7  ;;  %v1726_v19 = vld [vmem:[%s2302_s6 + $0x8] sm:$0xff]  ;;  %v1728_v20 = vld [vmem:[%s2302_s6 + $0x18] sm:$0xff]  ;;  %v1729_v21 = vld [vmem:[%s2302_s6 + $0x20] sm:$0xff] }
  0x28   : > { %v1725_v22 = vld [vmem:[%s2302_s6] sm:$0xff]  ;;  %v1727_v23 = vld [vmem:[%s2302_s6 + $0x10] sm:$0xff]  ;;  %v1732_v24 = vld [vmem:[%s2302_s6 + $0x38] sm:$0xff] }
  0x29   : > { %1567 = vmatmul.msk.bf16.vlgmr.msra.gmra.mxu0 %vm633_vm0, %v588_v15  ;;  %1576 = vmatmul.msk.bf16.vlgmr.msra.gmra.mxu1 %vm633_vm0, %v588_v15  ;;  %v1731_v25 = vld [vmem:[%s2302_s6 + $0x30] sm:$0xff]  ;;  %v1783_v32 = vld [vmem:[%s2301_s5] ss:$0 sm:$0xff]  ;;  %v1784_v33 = vld [vmem:[%s2301_s5 + $0x1] ss:$0 sm:$0xff] }
  0x2a   : > { %775 = vmatpush.bf16.msrb.mxu0 %v1718_v8  ;;  %800 = vmatpush.bf16.msrb.mxu1 %v1720_v9  ;;  %v1780_v40 = vld [vmem:[%s2347_s3 + $0x1] ss:$0 sm:$0xff]  ;;  %v1779_v43 = vld [vmem:[%s2347_s3] ss:$0 sm:$0xff]  ;;  %v1785_v44 = vld [vmem:[%s2301_s5 + $0x2] ss:$0 sm:$0xff] }
  0x2b   : > { %1585 = vmatmul.msk.bf16.vlgmr.msra.gmra.mxu2 %vm633_vm0, %v588_v15  ;;  %1594 = vmatmul.msk.bf16.vlgmr.msra.gmra.mxu3 %vm633_vm0, %v588_v15  ;;  %v1786_v45 = vld [vmem:[%s2301_s5 + $0x3] ss:$0 sm:$0xff]  ;;  %v1781_v57 = vld [vmem:[%s2347_s3 + $0x2] ss:$0 sm:$0xff]  ;;  %v1787_v6 = vld [vmem:[%s2303_s7] ss:$0 sm:$0xff] }
  0x2c   : > { %825 = vmatpush.bf16.msrb.mxu2 %v1722_v10  ;;  %850 = vmatpush.bf16.msrb.mxu3 %v1724_v11  ;;  %v1782_v58 = vld [vmem:[%s2347_s3 + $0x3] ss:$0 sm:$0xff]  ;;  %v1788_v7 = vld [vmem:[%s2303_s7 + $0x1] ss:$0 sm:$0xff]  ;;  %s577_s3 = scalar_lea.vmem [#allocation2], %s1557_s30  ;;  %s1841_s30 = scalar_lea.hbm %s2350_s23, 16 }
  0x2d   : > { %s1482_s4 = sshll.u32 %s577_s3, 4  ;;  %s1483_s4 = int_to_ptr.vmem [resolvable:$true] %s1482_s4 }
  0x2e   : > { %776 = vmatpush.bf16.msrb.mxu0 %v1717_v13  ;;  %801 = vmatpush.bf16.msrb.mxu1 %v1719_v14  ;;  %v1789_v13 = vld [vmem:[%s2303_s7 + $0x2] ss:$0 sm:$0xff] }
  0x30   : > { %826 = vmatpush.bf16.msrb.mxu2 %v1721_v16  ;;  %851 = vmatpush.bf16.msrb.mxu3 %v1723_v17 }
  0x32   : > { %907 = vmatpush.bf16.msra.mxu0 %v1726_v19  ;;  %932 = vmatpush.bf16.msra.mxu1 %v1728_v20 }
  0x34   : > { %957 = vmatpush.bf16.msra.mxu2 %v1730_v18  ;;  %982 = vmatpush.bf16.msra.mxu3 %v1732_v24  ;;  %v1790_v24 = vld [vmem:[%s2303_s7 + $0x3] ss:$0 sm:$0xff] }
  0x36   : > { %908 = vmatpush.bf16.msra.mxu0 %v1725_v22  ;;  %933 = vmatpush.bf16.msra.mxu1 %v1727_v23 }
  0x38   : > { %958 = vmatpush.bf16.msra.mxu2 %v1729_v21  ;;  %983 = vmatpush.bf16.msra.mxu3 %v1731_v25 }
  0x39   : > { %1603 = vmatmul.msk.bf16.vlgmr.msrb.gmra.mxu0 %vm633_vm0, %v588_v15  ;;  %1612 = vmatmul.msk.bf16.vlgmr.msrb.gmra.mxu1 %vm633_vm0, %v588_v15 }
  0x3b   : > { %1621 = vmatmul.msk.bf16.vlgmr.msrb.gmra.mxu2 %vm633_vm0, %v588_v15  ;;  %1630 = vmatmul.msk.bf16.vlgmr.msrb.gmra.mxu3 %vm633_vm0, %v588_v15 }
  0x49   : > { %1639 = vmatmul.msk.bf16.vlgmr.msra.gmra.mxu0 %vm633_vm0, %v588_v15  ;;  %1648 = vmatmul.msk.bf16.vlgmr.msra.gmra.mxu1 %vm633_vm0, %v588_v15 }
  0x4b   : > { %1657 = vmatmul.msk.bf16.vlgmr.msra.gmra.mxu2 %vm633_vm0, %v588_v15  ;;  %1666 = vmatmul.msk.bf16.vlgmr.msra.gmra.mxu3 %vm633_vm0, %v588_v15 }
  0xa6   : > { %v646_v26 = vpop.f32.mrf.mxu0  ;;  %v671_v27 = vpop.f32.mrf.mxu1 }
  0xa7   : > { %v672_v48 = vadd.f32 %v1780_v40, %v671_v27  ;;  %v647_v51 = vadd.f32 %v1779_v43, %v646_v26 }
  0xa9   : > { %v990_v56 = vpack.c.bf16 %v672_v48, %v672_v48  ;;  %v989_v61 = vpack.c.bf16 %v647_v51, %v647_v51 }
  0xae   : > { %v696_v28 = vpop.f32.mrf.mxu2  ;;  %v721_v29 = vpop.f32.mrf.mxu3 }
  0xaf   : > { %v648_v30 = vpop.f32.mrf.mxu0  ;;  %v673_v31 = vpop.f32.mrf.mxu1  ;;  %v697_v0 = vadd.f32 %v1781_v57, %v696_v28  ;;  %v722_v1 = vadd.f32 %v1782_v58, %v721_v29 }
  0xb0   : > { %v1791_v31 = vld [vmem:[%s584_s29] ss:$0 sm:$0xff]  ;;  %s1480_s29 = scalar_lea.hbm %s2350_s23, %s1706_s16 }
  0xb1   : > { %v991_v4 = vpack.c.bf16 %v697_v0, %v697_v0  ;;  %v992_v5 = vpack.c.bf16 %v722_v1, %v722_v1  ;;  %s1484_s0 = sshll.u32 %s1480_s29, 4  ;;  %s1485_s0 = int_to_ptr.hbm [resolvable:$true] %s1484_s0 }
  0xb2   : > { %s1835_s18 = sshra.s32 %s1485_s0, 4  ;;  %s1836_s18 = int_to_ptr.hbm [resolvable:$true] %s1835_s18 }
  0xb3   : > { %p1842_p0 = scmp.lt.s32.totalorder %s1836_s18, %s2350_s23 }
  0xb6   : > { %v698_v34 = vpop.f32.mrf.mxu2  ;;  %v723_v35 = vpop.f32.mrf.mxu3 }
  0xb7   : > { %v778_v36 = vpop.f32.mrf.mxu0  ;;  %v803_v37 = vpop.f32.mrf.mxu1 }
  0xb8   : > { %v779_v38 = vadd.f32 %v1783_v32, %v778_v36  ;;  %v804_v39 = vadd.f32 %v1784_v33, %v803_v37 }
  0xba   : > { %v993_v41 = vpack.c.bf16 %v779_v38, %v779_v38  ;;  %v994_v42 = vpack.c.bf16 %v804_v39, %v804_v39 }
  0xbc   : > { %v1005_v46 = vsel %vm1000_vm1, %v993_v41, 0  ;;  %v1024_v47 = vsel %vm1000_vm1, %v994_v42, 0 }
  0xbd   : > { %1014 = vmatpush.bf16.xpose.msrb.mxu0 %v1005_v46  ;;  %1033 = vmatpush.bf16.xpose.msrb.mxu1 %v1024_v47 }
  0xbe   : > { %v828_v49 = vpop.f32.mrf.mxu2  ;;  %v853_v50 = vpop.f32.mrf.mxu3 }
  0xbf   : > { %v829_v52 = vadd.f32 %v1785_v44, %v828_v49  ;;  %v854_v53 = vadd.f32 %v1786_v45, %v853_v50  ;;  %v780_v54 = vpop.f32.mrf.mxu0  ;;  %v805_v55 = vpop.f32.mrf.mxu1 }
  0xc1   : > { %v995_v59 = vpack.c.bf16 %v829_v52, %v829_v52  ;;  %v996_v60 = vpack.c.bf16 %v854_v53, %v854_v53 }
  0xc3   : > { %v1043_v62 = vsel %vm1000_vm1, %v995_v59, 0  ;;  %v1062_v63 = vsel %vm1000_vm1, %v996_v60, 0 }
  0xc4   : > { %1052 = vmatpush.bf16.xpose.msrb.mxu2 %v1043_v62  ;;  %1071 = vmatpush.bf16.xpose.msrb.mxu3 %v1062_v63 }
  0xc5   : > { %1667 = vmatmul.msk.bf16.vlgmr.msrb.gmra.mxu0 %vm1000_vm1, %v989_v61  ;;  %1668 = vmatmul.msk.bf16.vlgmr.msrb.gmra.mxu1 %vm1000_vm1, %v990_v56 }
  0xc6   : > { %v830_v2 = vpop.f32.mrf.mxu2  ;;  %v855_v3 = vpop.f32.mrf.mxu3 }
  0xc7   : > { %v910_v8 = vpop.f32.mrf.mxu0  ;;  %v935_v9 = vpop.f32.mrf.mxu1 }
  0xc8   : > { %v911_v10 = vadd.f32 %v1787_v6, %v910_v8  ;;  %v936_v11 = vadd.f32 %v1788_v7, %v935_v9 }
  0xca   : > { %v1125_v14 = vpack.c.bf16 %v911_v10, %v911_v10  ;;  %v1126_v15 = vpack.c.bf16 %v936_v11, %v936_v11 }
  0xcb   : > { %1669 = vmatmul.msk.bf16.vlgmr.msrb.gmra.mxu2 %vm1000_vm1, %v991_v4  ;;  %1670 = vmatmul.msk.bf16.vlgmr.msrb.gmra.mxu3 %vm1000_vm1, %v992_v5 }
  0xcc   : > { %v1134_v17 = vsel %vm1132_vm2, %v1125_v14, 0  ;;  %v1153_v18 = vsel %vm1132_vm2, %v1126_v15, 0 }
  0xcd   : > { %1143 = vmatpush.bf16.msra.mxu0 %v1134_v17  ;;  %1162 = vmatpush.bf16.msra.mxu1 %v1153_v18 }
  0xce   : > { %v960_v16 = vpop.f32.mrf.mxu2  ;;  %v985_v25 = vpop.f32.mrf.mxu3 }
  0xcf   : > { %v961_v19 = vadd.f32 %v1789_v13, %v960_v16  ;;  %v912_v21 = vpop.f32.mrf.mxu0  ;;  %v937_v22 = vpop.f32.mrf.mxu1  ;;  %v986_v27 = vadd.f32 %v1790_v24, %v985_v25  ;;  %v1212_v25 = vld [vmem:[%s2304_s8 + $0x8] sm:$0xf] }
  0xd0   : > { %v1210_v21 = vld [vmem:[%s2304_s8] sm:$0xf] }
  0xd1   : > { %v1127_v20 = vpack.c.bf16 %v961_v19, %v961_v19  ;;  %v1128_v28 = vpack.c.bf16 %v986_v27, %v986_v27  ;;  %v1218_v22 = vsel %vm1132_vm2, %v1210_v21, 0  ;;  %v1213_v27 = vld [vmem:[%s2304_s8 + $0xc] sm:$0xf]  ;;  %v1793_v21 = vld [vmem:[%s2306_s10] ss:$0 sm:$0xff] }
  0xd2   : > { %1227 = vmatpush.bf16.msrb.mxu0 %v1218_v22 }
  0xd3   : > { %v1172_v23 = vsel %vm1132_vm2, %v1127_v20, 0  ;;  %v1191_v29 = vsel %vm1132_vm2, %v1128_v28, 0  ;;  %v1275_v28 = vsel %vm1132_vm2, %v1213_v27, 0 }
  0xd4   : > { %1181 = vmatpush.bf16.msra.mxu2 %v1172_v23  ;;  %1200 = vmatpush.bf16.msra.mxu3 %v1191_v29  ;;  %v1211_v23 = vld [vmem:[%s2304_s8 + $0x4] sm:$0xf] }
  0xd5   : > { %v1237_v24 = vsel %vm1132_vm2, %v1211_v23, 0  ;;  %v1794_v23 = vld [vmem:[%s2307_s11] ss:$0 sm:$0xff] }
  0xd6   : > { %v962_v26 = vpop.f32.mrf.mxu2  ;;  %v987_v30 = vpop.f32.mrf.mxu3  ;;  %1246 = vmatpush.bf16.msrb.mxu1 %v1237_v24 }
  0xd7   : > { %v1256_v26 = vsel %vm1132_vm2, %v1212_v25, 0 }
  0xd8   : > { %1265 = vmatpush.bf16.msrb.mxu2 %v1256_v26  ;;  %1284 = vmatpush.bf16.msrb.mxu3 %v1275_v28  ;;  %v1736_v28 = vld [vmem:[%s2310_s14 + $0x8] sm:$0xff] }
 0x142   : > { %v1016_v32 = vpop.f32.mrf.mxu0  ;;  %v1035_v33 = vpop.f32.mrf.mxu1 }
 0x143   : > { %v1017_v34 = vadd.f32 %v1791_v31, %v1016_v32  ;;  %v1036_v36 = vadd.f32 %v1791_v31, %v1035_v33 }
 0x145   : > { %v1077_v35 = vsel %vm1000_vm1, %v1017_v34, -inf  ;;  %v1080_v39 = vsel %vm1000_vm1, %v1036_v36, -inf }
 0x146   : > { %1078 = vmax.xlane.f32.xlu1 %v1077_v35 }
 0x14a   : > { %v1018_v37 = vpop.f32.mrf.mxu0  ;;  %v1037_v38 = vpop.f32.mrf.mxu1 }
 0x14e   : > { %v1054_v40 = vpop.f32.mrf.mxu2  ;;  %v1073_v41 = vpop.f32.mrf.mxu3  ;;  %1081 = vmax.xlane.f32.xlu1 %v1080_v39 }
 0x14f   : > { %v1055_v42 = vadd.f32 %v1791_v31, %v1054_v40  ;;  %v1074_v44 = vadd.f32 %v1791_v31, %v1073_v41 }
 0x151   : > { %v1083_v43 = vsel %vm1000_vm1, %v1055_v42, -inf  ;;  %v1086_v47 = vsel %vm1000_vm1, %v1074_v44, -inf }
 0x152   : > { %1084 = vmax.xlane.f32.xlu0 %v1083_v43 }
 0x156   : > { %v1056_v45 = vpop.f32.mrf.mxu2  ;;  %v1075_v46 = vpop.f32.mrf.mxu3 }
 0x15a   : > { %1087 = vmax.xlane.f32.xlu0 %v1086_v47 }
 0x1b9   : > { %v1079_v48 = vpop.xlane.xlu1 %1078 }
 0x1ba   : > { %v1089_v49 = vsub.f32 %v1017_v34, %v1079_v48 }
 0x1bc   : > { %v1093_v50 = vmul.f32 1.442695, %v1089_v49 }
 0x1be   : > { %1799 = vpow2.f32 %v1093_v50 }
 0x1c1   : > { %v1082_v51 = vpop.xlane.xlu1 %1081 }
 0x1c2   : > { %v1090_v52 = vsub.f32 %v1036_v36, %v1082_v51 }
 0x1c4   : > { %v1800_v53 = vpop.eup %1799  ;;  %v1095_v54 = vmul.f32 1.442695, %v1090_v52 }
 0x1c5   : > { %v1085_v55 = vpop.xlane.xlu0 %1084  ;;  %v1101_v56 = vsel %vm1000_vm1, %v1800_v53, 0.0 }
 0x1c6   : > { %1801 = vpow2.f32 %v1095_v54  ;;  %v1091_v57 = vsub.f32 %v1055_v42, %v1085_v55  ;;  %1102 = vadd.xlane.f32.xlu0 %v1101_v56 }
 0x1c8   : > { %v1097_v58 = vmul.f32 1.442695, %v1091_v57 }
 0x1ca   : > { %1803 = vpow2.f32 %v1097_v58 }
 0x1cc   : > { %v1802_v59 = vpop.eup %1801 }
 0x1cd   : > { %v1088_v60 = vpop.xlane.xlu0 %1087  ;;  %v1104_v61 = vsel %vm1000_vm1, %v1802_v59, 0.0 }
 0x1ce   : > { %v1092_v62 = vsub.f32 %v1074_v44, %v1088_v60  ;;  %1105 = vadd.xlane.f32.xlu1 %v1104_v61  ;;  %v1885_v60 = vmov 32.0  }
 0x1d0   : > { %v1804_v63 = vpop.eup %1803  ;;  %v1099_v0 = vmul.f32 1.442695, %v1092_v62 }
 0x1d1   : > { %v1107_v1 = vsel %vm1000_vm1, %v1804_v63, 0.0 }
 0x1d2   : > { %1805 = vpow2.f32 %v1099_v0  ;;  %1108 = vadd.xlane.f32.xlu2 %v1107_v1 }
 0x1d8   : > { %v1806_v2 = vpop.eup %1805 }
 0x1d9   : > { %v1110_v3 = vsel %vm1000_vm1, %v1806_v2, 0.0 }
 0x1da   : > { %1111 = vadd.xlane.f32.xlu2 %v1110_v3 }
 0x239   : > { %v1103_v4 = vpop.xlane.xlu0 %1102 }
 0x23a   : > { %1807 = vrcp.f32 %v1103_v4 }
 0x240   : > { %v1808_v5 = vpop.eup %1807 }
 0x241   : > { %v1117_v6 = vmul.f32 %v1808_v5, %v1800_v53  ;;  %v1106_v7 = vpop.xlane.xlu1 %1105  ;;  %v1792_v53 = vld [vmem:[%s2305_s9] ss:$0 sm:$0xff] }
 0x242   : > { %1809 = vrcp.f32 %v1106_v7 }
 0x243   : > { %v1121_v8 = vpack.c.bf16 %v1117_v6, %v1117_v6 }
 0x245   : > { %v1109_v9 = vpop.xlane.xlu2 %1108  ;;  %1671 = vmatmul.msk.bf16.vlgmr.msra.gmra.mxu0 %vm1000_vm1, %v1121_v8  ;;  %v1733_v8 = vld [vmem:[%s2308_s12] sm:$0xff] }
 0x246   : > { %1811 = vrcp.f32 %v1109_v9  ;;  %v1738_v9 = vld [vmem:[%s2310_s14 + $0x18] sm:$0xff] }
 0x248   : > { %v1810_v10 = vpop.eup %1809 }
 0x249   : > { %v1118_v11 = vmul.f32 %v1810_v10, %v1802_v59 }
 0x24b   : > { %v1122_v13 = vpack.c.bf16 %v1118_v11, %v1118_v11 }
 0x24c   : > { %v1812_v14 = vpop.eup %1811 }
 0x24d   : > { %v1119_v15 = vmul.f32 %v1812_v14, %v1804_v63  ;;  %v1112_v16 = vpop.xlane.xlu2 %1111  ;;  %1672 = vmatmul.msk.bf16.vlgmr.msra.gmra.mxu1 %vm1000_vm1, %v1122_v13  ;;  %v1737_v13 = vld [vmem:[%s2310_s14 + $0x10] sm:$0xff] }
 0x24e   : > { %1813 = vrcp.f32 %v1112_v16  ;;  %1425 = vmatpush.bf16.msra.mxu1 %v1738_v9 }
 0x24f   : > { %v1123_v17 = vpack.c.bf16 %v1119_v15, %v1119_v15  ;;  %1815 = vrcp.f32 %v1885_v60 }
 0x251   : > { %1673 = vmatmul.msk.bf16.vlgmr.msra.gmra.mxu2 %vm1000_vm1, %v1123_v17 }
 0x252   : > { %1426 = vmatpush.bf16.msra.mxu1 %v1737_v13 }
 0x254   : > { %v1814_v18 = vpop.eup %1813 }
 0x255   : > { %v1120_v19 = vmul.f32 %v1814_v18, %v1806_v2  ;;  %v1816_v61 = vpop.eup %1815 }
 0x256   : > { %v1309_v62 = vmul.f32 32.0, %v1816_v61  ;;  %vm1313_vm3 = vweird.f32 %v1816_v61  ;;  %1427 = vmatpush.bf16.msra.mxu1 %v1736_v28 }
 0x257   : > { %v1124_v20 = vpack.c.bf16 %v1120_v19, %v1120_v19 }
 0x258   : > { %v1310_v63 = vsub.f32 1.0, %v1309_v62 }
 0x259   : > { %1674 = vmatmul.msk.bf16.vlgmr.msra.gmra.mxu3 %vm1000_vm1, %v1124_v20 }
 0x25a   : > { %v1311_v0 = vmul.f32 %v1816_v61, %v1310_v63 }
 0x25c   : > { %v1312_v1 = vadd.f32 %v1816_v61, %v1311_v0 }
 0x25e   : > { %v1314_v2 = vsel %vm1313_vm3, %v1816_v61, %v1312_v1 }
 0x2c2   : > { %v1145_v29 = vpop.f32.mrf.mxu0 }
 0x2c3   : > { %v1206_v30 = vpack.c.bf16 %v1145_v29, %v1145_v29  ;;  %v1735_v29 = vld [vmem:[%s2310_s14] sm:$0xff] }
 0x2c4   : > { %1428 = vmatpush.bf16.msra.mxu1 %v1735_v29 }
 0x2c5   : > { %1675 = vmatmul.msk.bf16.vlgmr.msrb.gmra.mxu0 %vm1000_vm1, %v1206_v30  ;;  %v1795_v30 = vld [vmem:[%s2309_s13] ss:$0 sm:$0xff] }
 0x2ca   : > { %v1147_v31 = vpop.f32.mrf.mxu0  ;;  %v1164_v32 = vpop.f32.mrf.mxu1 }
 0x2cb   : > { %v1207_v33 = vpack.c.bf16 %v1164_v32, %v1164_v32 }
 0x2cd   : > { %1676 = vmatmul.msk.bf16.vlgmr.msrb.gmra.mxu1 %vm1000_vm1, %v1207_v33 }
 0x2d2   : > { %v1166_v34 = vpop.f32.mrf.mxu1 }
 0x2d4   : > { %v1183_v35 = vpop.f32.mrf.mxu2 }
 0x2d5   : > { %v1208_v36 = vpack.c.bf16 %v1183_v35, %v1183_v35 }
 0x2d7   : > { %1677 = vmatmul.msk.bf16.vlgmr.msrb.gmra.mxu2 %vm1000_vm1, %v1208_v36  ;;  %v1796_v36 = vld [vmem:[%s2311_s15] ss:$0 sm:$0xff] }
 0x2dc   : > { %v1185_v37 = vpop.f32.mrf.mxu2  ;;  %v1202_v38 = vpop.f32.mrf.mxu3 }
 0x2dd   : > { %v1209_v39 = vpack.c.bf16 %v1202_v38, %v1202_v38 }
 0x2df   : > { %1678 = vmatmul.msk.bf16.vlgmr.msrb.gmra.mxu3 %vm1000_vm1, %v1209_v39 }
 0x2e4   : > { %v1204_v40 = vpop.f32.mrf.mxu3 }
 0x342   : > { %v1229_v41 = vpop.f32.mrf.mxu0 }
 0x343   : > { %v1290_v47 = vsel %vm633_vm0, %v1229_v41, 0.0 }
 0x34a   : > { %v1231_v42 = vpop.f32.mrf.mxu0  ;;  %v1248_v43 = vpop.f32.mrf.mxu1 }
 0x34b   : > { %v1291_v46 = vsel %vm633_vm0, %v1248_v43, 0.0 }
 0x34c   : > { %v1292_v49 = vadd.f32 %v1291_v46, %v1290_v47 }
 0x352   : > { %v1250_v44 = vpop.f32.mrf.mxu1 }
 0x35a   : > { %v1267_v45 = vpop.f32.mrf.mxu2 }
 0x35b   : > { %v1293_v48 = vsel %vm633_vm0, %v1267_v45, 0.0 }
 0x35c   : > { %v1294_v50 = vadd.f32 %v1293_v48, %v1292_v49 }
 0x362   : > { %v1269_v51 = vpop.f32.mrf.mxu2  ;;  %v1286_v52 = vpop.f32.mrf.mxu3 }
 0x363   : > { %v1295_v54 = vsel %vm633_vm0, %v1286_v52, 0.0 }
 0x364   : > { %v1296_v55 = vadd.f32 %v1295_v54, %v1294_v50 }
 0x366   : > { %v1301_v56 = vadd.f32 %v1792_v53, %v1296_v55 }
 0x368   : > { %v1302_v57 = vadd.f32 %v1301_v56, %v2073_v12  ;;  %v1734_v12 = vld [vmem:[%s2308_s12 + $0x8] sm:$0xff]  ;;  %v1797_v56 = vld [vmem:[%s2348_s2] ss:$0 sm:$0xff]  ;;  %s1837_s2 = scalar_lea.hbm %s1836_s18, 8 }
 0x369   : > { %1372 = vmatpush.bf16.msra.mxu0 %v1734_v12  ;;  %p1838_p11 = scmp.ne.s32.totalorder %s1836_s18, %s1837_s2  ;;  %p1843_p1 = scmp.lt.s32.totalorder %s1841_s30, %s1837_s2 }
 0x36a   : > { %v1288_v58 = vpop.f32.mrf.mxu3  ;;  %v1305_v59 = vsel %vm633_vm0, %v1302_v57, 0.0 }
 0x36b   : > { %1306 = vadd.xlane.f32.xlu2 %v1305_v59  ;;  %v1798_v59 = vld [vmem:[%s2349_s25] ss:$0 sm:$0xff]  ;;  %p1839_p12 = pnand %p1838_p11, %p2019_p5  ;;  %p1844_p2 = por %p1843_p1, %p1842_p0 }
 0x36d   : > { %1373 = vmatpush.bf16.msra.mxu0 %v1733_v8  ;;  %p1840_p13 = pneg %p1839_p12 }
 0x36f   : > { %p1845_p3 = pnand %p1844_p2, %p1840_p13 }
 0x3de   : > { %v1307_v3 = vpop.xlane.xlu2 %1306 }
 0x3df   : > { %v1315_v4 = vmul.f32 %v1314_v2, %v1307_v3 }
 0x3e1   : > { %v1316_v5 = vsub.f32 %v1302_v57, %v1315_v4 }
 0x3e3   : > { %v1317_v6 = vmul.f32 %v1316_v5, %v1316_v5 }
 0x3e5   : > { %v1318_v7 = vsel %vm633_vm0, %v1317_v6, 0.0 }
 0x3e6   : > { %1319 = vadd.xlane.f32.xlu0 %v1318_v7 }
 0x459   : > { %v1320_v10 = vpop.xlane.xlu0 %1319 }
 0x45a   : > { %v1321_v11 = vmul.f32 %v1320_v10, %v1314_v2 }
 0x45c   : > { %v1322_v14 = vadd.f32 1e-06, %v1321_v11 }
 0x45e   : > { %1817 = vrsqrt.f32 %v1322_v14  ;;  %vm1329_vm5 = vweird.f32 %v1322_v14 }
 0x464   : > { %v1818_v15 = vpop.eup %1817 }
 0x465   : > { %v1324_v16 = vmul.f32 %v1818_v15, %v1322_v14  ;;  %vm1330_vm4 = vweird.f32 %v1818_v15 }
 0x466   : > { %vm1331_vm6 = vmor %vm1329_vm5, %vm1330_vm4 }
 0x467   : > { %v1325_v17 = vmul.f32 %v1818_v15, %v1324_v16 }
 0x469   : > { %v1326_v18 = vmul.f32 0.5, %v1325_v17 }
 0x46b   : > { %v1327_v19 = vsub.f32 1.5, %v1326_v18 }
 0x46d   : > { %v1328_v20 = vmul.f32 %v1818_v15, %v1327_v19 }
 0x46f   : > { %v1332_v22 = vsel %vm1331_vm6, %v1818_v15, %v1328_v20 }
 0x470   : > { %v1333_v24 = vmul.f32 %v1332_v22, %v1316_v5 }
 0x472   : > { %v1337_v25 = vmul.f32 %v1793_v21, %v1333_v24 }
 0x474   : > { %v1341_v26 = vadd.f32 %v1794_v23, %v1337_v25 }
 0x476   : > { %v1342_v27 = vpack.c.bf16 %v1341_v26, %v1341_v26 }
 0x478   : > { %1687 = vmatmul.msk.bf16.vlgmr.msra.gmra.mxu0 %vm633_vm0, %v1342_v27 }
 0x4f5   : > { %v1375_v31 = vpop.f32.mrf.mxu0 }
 0x4f6   : > { %v1376_v32 = vadd.f32 %v1795_v30, %v1375_v31 }
 0x4f8   : > { %v1379_v33 = vmax.f32 %v1376_v32, 0.0 }
 0x4fa   : > { %v1380_v34 = vpack.c.bf16 %v1379_v33, %v1379_v33 }
 0x4fc   : > { %1704 = vmatmul.msk.bf16.vlgmr.msra.gmra.mxu1 %vm1417_vm7, %v1380_v34 }
 0x4fd   : > { %v1377_v35 = vpop.f32.mrf.mxu0 }
 0x579   : > { %v1430_v37 = vpop.f32.mrf.mxu1 }
 0x57a   : > { %v1431_v38 = vadd.f32 %v1796_v36, %v1430_v37 }
 0x57c   : > { %v1434_v39 = vadd.f32 %v1431_v38, %v1341_v26 }
 0x57e   : > { %v1437_v40 = vsel %vm633_vm0, %v1434_v39, 0.0 }
 0x57f   : > { %1438 = vadd.xlane.f32.xlu1 %v1437_v40 }
 0x581   : > { %v1432_v41 = vpop.f32.mrf.mxu1 }
 0x5f2   : > { %v1439_v42 = vpop.xlane.xlu1 %1438 }
 0x5f3   : > { %v1440_v43 = vmul.f32 %v1439_v42, %v1314_v2 }
 0x5f5   : > { %v1441_v44 = vsub.f32 %v1434_v39, %v1440_v43 }
 0x5f7   : > { %v1442_v45 = vmul.f32 %v1441_v44, %v1441_v44 }
 0x5f9   : > { %v1443_v46 = vsel %vm633_vm0, %v1442_v45, 0.0 }
 0x5fa   : > { %1444 = vadd.xlane.f32.xlu2 %v1443_v46 }
 0x66d   : > { %v1445_v47 = vpop.xlane.xlu2 %1444 }
 0x66e   : > { %v1446_v48 = vmul.f32 %v1445_v47, %v1314_v2 }
 0x670   : > { %v1447_v49 = vadd.f32 1e-06, %v1446_v48 }
 0x672   : > { %1819 = vrsqrt.f32 %v1447_v49  ;;  %vm1454_vm9 = vweird.f32 %v1447_v49 }
 0x678   : > { %v1820_v50 = vpop.eup %1819 }
 0x679   : > { %v1449_v51 = vmul.f32 %v1820_v50, %v1447_v49  ;;  %vm1455_vm8 = vweird.f32 %v1820_v50 }
 0x67a   : > { %vm1456_vm10 = vmor %vm1454_vm9, %vm1455_vm8 }
 0x67b   : > { %v1450_v52 = vmul.f32 %v1820_v50, %v1449_v51 }
 0x67d   : > { %v1451_v53 = vmul.f32 0.5, %v1450_v52 }
 0x67f   : > { %v1452_v54 = vsub.f32 1.5, %v1451_v53 }
 0x681   : > { %v1453_v55 = vmul.f32 %v1820_v50, %v1452_v54 }
 0x683   : > { %v1457_v57 = vsel %vm1456_vm10, %v1820_v50, %v1453_v55 }
 0x684   : > { %v1458_v58 = vmul.f32 %v1457_v57, %v1441_v44 }
 0x686   : > { %v1462_v60 = vmul.f32 %v1797_v56, %v1458_v58 }
 0x688   : > { %v1466_v61 = vadd.f32 %v1798_v59, %v1462_v60 }
 0x68a   : > { %v1467_v62 = vmax.f32 %v1466_v61, 0.0 }
 0x68c   : > { %1468 = vst.msk [vmem:[%s577_s3] sm:$0xff] %vm633_vm0, %v1467_v62 }
 0x68d   : > { %1848 = shalt.err (!%p1845_p3)
}
 0x68e   : > { %1739 = dma.vmem_to_hbm [thread:$0]  (%p2019_p5), %s1483_s4, 128, %s1485_s0, %s1470_s17  }
 0x68f PF: > { %s2352_s3 = sld [smem:[#allocation7_spill]] }
 0x690   : > { %s2353_s24 = sld [smem:[#allocation5_spill]] }
 0x695   : > { %p1745_p4 = scmp.ge.s32.totalorder %s2352_s3, 2 }
 0x696   : > { %s1496_s1 = sand.u32 1, %s2353_s24  }
 0x697   : > { %p1742_p7 = pnand %p1745_p4, %p2023_p6  ;;  %s1497_s29 = scalar_lea.sflag [#allocation3], %s1496_s1 }
 0x699   : > { %p1743_p8 = pneg %p1742_p7 }
 0x69b   : > { %1866 = dma.done.wait (%p1743_p8), %s1497_s29, 128  }
 0x69c   : > { %1868 = vsyncadd (%p1743_p8), %s1497_s29, 4294967168  ;;  %s2355_s30 = sld [smem:[#allocation8_spill]]  ;;  %s2358_s27 = smov %s1875_s28 }
 0x69d   : > { %s2356_s18 = sld [smem:[#allocation6_spill]] }
 0x69e   : > { %s2357_s29 = sld [smem:[#allocation9_spill]] }
 0x6a2   : > { %p28_p9 = scmp.ge.s32.totalorder %s2355_s30, 4  }
 0x6a3   : > { %s2359_s28 = smov %s2356_s18 }
 0x6a4   :  { %30 = sbr.rel (!%p28_p9) target bundleno = 12 (0xc), region = 130 }
 0x6a9   :  { %1503 = vsyncpa [#allocation3], 1 }
 0x6aa   :  { %1505 = vsyncpa [#allocation3 + $0x1], 1 }

// kernel: tpu_custom_call.1
= control target key start
LH: loop header
LB: loop body
LE: loop exit
PB: predicated region body
PF: predicated region fallthrough
CT: control target
= control target key end

     0   :  { %s2296_s0 = inlined_call_operand.vmem [shape: f32[2,8,32], index: 0, kind: input, shape index: {}]   ;;  %s2297_s1 = inlined_call_operand.vmem [shape: f32[2,1,8], index: 1, kind: input, shape index: {}]   ;;  %s2298_s2 = inlined_call_operand.vmem [shape: bf16[4,32,8], index: 2, kind: input, shape index: {}]   ;;  %s2299_s3 = inlined_call_operand.vmem [shape: f32[4,1,8], index: 3, kind: input, shape index: {}]   ;;  %s2300_s4 = inlined_call_operand.vmem [shape: bf16[4,32,8], index: 4, kind: input, shape index: {}]   ;;  %s2301_s5 = inlined_call_operand.vmem [shape: f32[4,1,8], index: 5, kind: input, shape index: {}]   ;;  %s2302_s6 = inlined_call_operand.vmem [shape: bf16[4,32,8], index: 6, kind: input, shape index: {}]   ;;  %s2303_s7 = inlined_call_operand.vmem [shape: f32[4,1,8], index: 7, kind: input, shape index: {}]   ;;  %s2304_s8 = inlined_call_operand.vmem [shape: bf16[4,8,32], index: 8, kind: input, shape index: {}]   ;;  %s2305_s9 = inlined_call_operand.vmem [shape: f32[1,32], index: 9, kind: input, shape index: {}]   ;;  %s2306_s10 = inlined_call_operand.vmem [shape: f32[1,32], index: 10, kind: input, shape index: {}]   ;;  %s2307_s11 = inlined_call_operand.vmem [shape: f32[1,32], index: 11, kind: input, shape index: {}]   ;;  %s2308_s12 = inlined_call_operand.vmem [shape: bf16[32,64], index: 12, kind: input, shape index: {}]   ;;  %s2309_s13 = inlined_call_operand.vmem [shape: f32[1,64], index: 13, kind: input, shape index: {}]   ;;  %s2310_s14 = inlined_call_operand.vmem [shape: bf16[64,32], index: 14, kind: input, shape index: {}]   ;;  %s2311_s15 = inlined_call_operand.vmem [shape: f32[1,32], index: 15, kind: input, shape index: {}]   ;;  %s2312_s16 = inlined_call_operand.vmem [shape: f32[1,32], index: 16, kind: input, shape index: {}]   ;;  %s2313_s17 = inlined_call_operand.vmem [shape: f32[1,32], index: 17, kind: input, shape index: {}]   ;;  %s2314_s18 = inlined_call_operand.hbm [shape: f32[2,8,32], index: 18, kind: output, shape index: {}]  }
   0x1   :  { %2326 = sst [smem:[#allocation12_spill]] %s2296_s0 }
   0x2   :  { %2327 = sst [smem:[#allocation13_spill]] %s2297_s1 }
   0x3   :  { %2328 = sst [smem:[#allocation14_spill]] %s2298_s2 }
   0x4   :  { %2329 = sst [smem:[#allocation15_spill]] %s2299_s3 }
   0x5   :  { %2330 = sst [smem:[#allocation16_spill]] %s2300_s4 }
   0x6   :  { %2331 = sst [smem:[#allocation17_spill]] %s2312_s16 }
   0x7   :  { %2332 = sst [smem:[#allocation18_spill]] %s2313_s17 }
   0x8   :  { %2333 = sst [smem:[#allocation19_spill]] %s2314_s18 }
   0x9   :  { %23 = vsyncpa [#allocation3], 0 }
   0xa   :  { %25 = vsyncpa [#allocation3 + $0x1], 0  ;;  %s1981_s27 = smov 0   ;;  %s1983_s28 = smov 0  }
   0xb   :  { %s1985_s29 = smov 0   ;;  %s1987_s30 = smov 0  }
   0xc LB: > { %2334 = sst [smem:[#allocation5_spill]] %s1871_s27  ;;  %s2002_s0 = sadd.s32 4294967295, %s1883_s30   ;;  %s1883_s30 = sphi %s1987_s30, %s2355_s30   ;;  %s1879_s29 = sphi %s1985_s29, %s2357_s29   ;;  %s1875_s28 = sphi %s1983_s28, %s2359_s28   ;;  %s1871_s27 = sphi %s1981_s27, %s2358_s27  }
   0xd   : > { %2335 = sst [smem:[#allocation6_spill]] %s1879_s29  ;;  %s1553_s19 = sadd.s32 4294967294, %s1883_s30  }
   0xe   : > { %2336 = sst [smem:[#allocation7_spill]] %s1883_s30  ;;  %s2006_s1 = sadd.s32 1, %s1883_s30  }
   0xf   : > { %2337 = sst [smem:[#allocation8_spill]] %s2006_s1  ;;  %s426_s20 = sadd.s32 1, %s1879_s29 }
  0x10   : > { %s423_s21 = ssub.s32 %s1883_s30, %s2006_s1  ;;  %p436_p0 = scmp.ne.s32.totalorder %s1879_s29, %s1875_s28 }
  0x11   : > { %p424_p1 = scmp.eq.s32.totalorder %s423_s21, 0  ;;  %p437_p2 = scmp.eq.s32.totalorder %s2002_s0, 1 }
  0x12   : > { %p442_p3 = scmp.ne.s32.totalorder %s1875_s28, %s1871_s27  ;;  %p443_p4 = scmp.eq.s32.totalorder %s1553_s19, 1 }
  0x13   : > { %s2017_s22 = scalar_select %p424_p1, %s1879_s29, %s426_s20  }
  0x14   : > { %p2019_p5 = por %p437_p2, %p436_p0  ;;  %p2023_p6 = por %p443_p4, %p442_p3 }
  0x15   : > { %2338 = sst [smem:[#allocation9_spill]] %s2017_s22  ;;  %p1556_p7 = scmp.ge.s32.totalorder %s1883_s30, 1 }
  0x16   : > { %s2339_s2 = scalar_select %p2019_p5, 1, 0 }
  0x17   : > { %s2341_s23 = scalar_select %p2023_p6, 1, 0 }
  0x18   : > { %2340 = sst [smem:[#allocation10_spill]] %s2339_s2  ;;  %p522_p8 = scmp.lt.s32.totalorder %s1883_s30, 3 }
  0x19   : > { %2342 = sst [smem:[#allocation11_spill]] %s2341_s23 }
  0x1a   : > { %p523_p9 = pnand %p1556_p7, %p522_p8 }
  0x1b   : > { %s2343_s26 = sld [smem:[#allocation14_spill]] (!%p523_p9)  ;;  %p578_p10 = scmp.lt.s32.totalorder (!%p523_p9), %s2002_s0, 1 }
  0x1c   : > { %526 = sbr.rel (%p523_p9) target bundleno = 1679 (0x68f), region = 92  ;;  %s2344_s4 = sld [smem:[#allocation16_spill]] (!%p523_p9) }
  0x1d   : > { %s2345_s18 = sld [smem:[#allocation12_spill]] (!%p523_p9)  ;;  %s575_s24 = sand.u32 (!%p523_p9), 1, %s1875_s28  }
  0x1e   : > { %s2346_s20 = sld [smem:[#allocation13_spill]] (!%p523_p9)  ;;  %s1557_s30 = sshll.u32 (!%p523_p9), %s575_s24, 3 }
  0x1f   : > { %s2347_s3 = sld [smem:[#allocation15_spill]] (!%p523_p9)  ;;  %s1706_s16 = sshll.u32 (!%p523_p9), %s2002_s0, 3 }
  0x20   : > { %s2348_s2 = sld [smem:[#allocation17_spill]] (!%p523_p9) }
  0x21   : > { %v1710_v0 = vld [vmem:[%s2343_s26 + $0x8] sm:$0xff]  ;;  %v1712_v1 = vld [vmem:[%s2343_s26 + $0x18] sm:$0xff]  ;;  %v1709_v4 = vld [vmem:[%s2343_s26] sm:$0xff]  ;;  %s2049_s19 = scalar_select %p578_p10, %s2002_s0, 1  ;;  %vm633_vm0 = vcmask 261120   ;;  %vm1000_vm1 = vcmask 64512  }
  0x22   : > { %v1714_v2 = vld [vmem:[%s2343_s26 + $0x28] sm:$0xff]  ;;  %v1716_v3 = vld [vmem:[%s2343_s26 + $0x38] sm:$0xff]  ;;  %643 = vmatpush.bf16.msra.mxu0 %v1710_v0  ;;  %668 = vmatpush.bf16.msra.mxu1 %v1712_v1  ;;  %v1711_v5 = vld [vmem:[%s2343_s26 + $0x10] sm:$0xff]  ;;  %vm1132_vm2 = vcmask 1043456   ;;  %vm1417_vm7 = vcmask 523264   ;;  %s2349_s25 = sld [smem:[#allocation18_spill]] }
  0x23   : > { %693 = vmatpush.bf16.msra.mxu2 %v1714_v2  ;;  %718 = vmatpush.bf16.msra.mxu3 %v1716_v3  ;;  %v1713_v6 = vld [vmem:[%s2343_s26 + $0x20] sm:$0xff]  ;;  %v1715_v7 = vld [vmem:[%s2343_s26 + $0x30] sm:$0xff]  ;;  %s1558_s21 = sshll.u32 %s2049_s19, 3  ;;  %v1718_v8 = vld [vmem:[%s2344_s4 + $0x8] sm:$0xff]  ;;  %s2350_s23 = sld [smem:[#allocation19_spill]] }
  0x24   : > { %v1720_v9 = vld [vmem:[%s2344_s4 + $0x18] sm:$0xff]  ;;  %s581_s17 = scalar_lea.vmem %s2345_s18, %s1558_s21  ;;  %v1722_v10 = vld [vmem:[%s2344_s4 + $0x28] sm:$0xff]  ;;  %v1717_v13 = vld [vmem:[%s2344_s4] sm:$0xff]  ;;  %s584_s29 = scalar_lea.vmem %s2346_s20, %s2049_s19 }
  0x25   : > { %v1724_v11 = vld [vmem:[%s2344_s4 + $0x38] sm:$0xff]  ;;  %v2073_v12 = vld [vmem:[%s581_s17] sm:$0xff]  ;;  %v1719_v14 = vld [vmem:[%s2344_s4 + $0x10] sm:$0xff]  ;;  %s1470_s17 = scalar_lea.sflag [#allocation3], %s575_s24 }
  0x26   : > { %644 = vmatpush.bf16.msra.mxu0 %v1709_v4  ;;  %669 = vmatpush.bf16.msra.mxu1 %v1711_v5  ;;  %v588_v15 = vpack.c.bf16 %v2073_v12, %v2073_v12  ;;  %v1721_v16 = vld [vmem:[%s2344_s4 + $0x20] sm:$0xff]  ;;  %v1723_v17 = vld [vmem:[%s2344_s4 + $0x30] sm:$0xff]  ;;  %v1730_v18 = vld [vmem:[%s2302_s6 + $0x28] sm:$0xff] }
  0x27   : > { %694 = vmatpush.bf16.msra.mxu2 %v1713_v6  ;;  %719 = vmatpush.bf16.msra.mxu3 %v1715_v7  ;;  %v1726_v19 = vld [vmem:[%s2302_s6 + $0x8] sm:$0xff]  ;;  %v1728_v20 = vld [vmem:[%s2302_s6 + $0x18] sm:$0xff]  ;;  %v1729_v21 = vld [vmem:[%s2302_s6 + $0x20] sm:$0xff] }
  0x28   : > { %v1725_v22 = vld [vmem:[%s2302_s6] sm:$0xff]  ;;  %v1727_v23 = vld [vmem:[%s2302_s6 + $0x10] sm:$0xff]  ;;  %v1732_v24 = vld [vmem:[%s2302_s6 + $0x38] sm:$0xff] }
  0x29   : > { %1567 = vmatmul.msk.bf16.vlgmr.msra.gmra.mxu0 %vm633_vm0, %v588_v15  ;;  %1576 = vmatmul.msk.bf16.vlgmr.msra.gmra.mxu1 %vm633_vm0, %v588_v15  ;;  %v1731_v25 = vld [vmem:[%s2302_s6 + $0x30] sm:$0xff]  ;;  %v1783_v32 = vld [vmem:[%s2301_s5] ss:$0 sm:$0xff]  ;;  %v1784_v33 = vld [vmem:[%s2301_s5 + $0x1] ss:$0 sm:$0xff] }
  0x2a   : > { %775 = vmatpush.bf16.msrb.mxu0 %v1718_v8  ;;  %800 = vmatpush.bf16.msrb.mxu1 %v1720_v9  ;;  %v1780_v40 = vld [vmem:[%s2347_s3 + $0x1] ss:$0 sm:$0xff]  ;;  %v1779_v43 = vld [vmem:[%s2347_s3] ss:$0 sm:$0xff]  ;;  %v1785_v44 = vld [vmem:[%s2301_s5 + $0x2] ss:$0 sm:$0xff] }
  0x2b   : > { %1585 = vmatmul.msk.bf16.vlgmr.msra.gmra.mxu2 %vm633_vm0, %v588_v15  ;;  %1594 = vmatmul.msk.bf16.vlgmr.msra.gmra.mxu3 %vm633_vm0, %v588_v15  ;;  %v1786_v45 = vld [vmem:[%s2301_s5 + $0x3] ss:$0 sm:$0xff]  ;;  %v1781_v57 = vld [vmem:[%s2347_s3 + $0x2] ss:$0 sm:$0xff]  ;;  %v1787_v6 = vld [vmem:[%s2303_s7] ss:$0 sm:$0xff] }
  0x2c   : > { %825 = vmatpush.bf16.msrb.mxu2 %v1722_v10  ;;  %850 = vmatpush.bf16.msrb.mxu3 %v1724_v11  ;;  %v1782_v58 = vld [vmem:[%s2347_s3 + $0x3] ss:$0 sm:$0xff]  ;;  %v1788_v7 = vld [vmem:[%s2303_s7 + $0x1] ss:$0 sm:$0xff]  ;;  %s577_s3 = scalar_lea.vmem [#allocation2], %s1557_s30  ;;  %s1841_s30 = scalar_lea.hbm %s2350_s23, 16 }
  0x2d   : > { %s1482_s4 = sshll.u32 %s577_s3, 4  ;;  %s1483_s4 = int_to_ptr.vmem [resolvable:$true] %s1482_s4 }
  0x2e   : > { %776 = vmatpush.bf16.msrb.mxu0 %v1717_v13  ;;  %801 = vmatpush.bf16.msrb.mxu1 %v1719_v14  ;;  %v1789_v13 = vld [vmem:[%s2303_s7 + $0x2] ss:$0 sm:$0xff] }
  0x30   : > { %826 = vmatpush.bf16.msrb.mxu2 %v1721_v16  ;;  %851 = vmatpush.bf16.msrb.mxu3 %v1723_v17 }
  0x32   : > { %907 = vmatpush.bf16.msra.mxu0 %v1726_v19  ;;  %932 = vmatpush.bf16.msra.mxu1 %v1728_v20 }
  0x34   : > { %957 = vmatpush.bf16.msra.mxu2 %v1730_v18  ;;  %982 = vmatpush.bf16.msra.mxu3 %v1732_v24  ;;  %v1790_v24 = vld [vmem:[%s2303_s7 + $0x3] ss:$0 sm:$0xff] }
  0x36   : > { %908 = vmatpush.bf16.msra.mxu0 %v1725_v22  ;;  %933 = vmatpush.bf16.msra.mxu1 %v1727_v23 }
  0x38   : > { %958 = vmatpush.bf16.msra.mxu2 %v1729_v21  ;;  %983 = vmatpush.bf16.msra.mxu3 %v1731_v25 }
  0x39   : > { %1603 = vmatmul.msk.bf16.vlgmr.msrb.gmra.mxu0 %vm633_vm0, %v588_v15  ;;  %1612 = vmatmul.msk.bf16.vlgmr.msrb.gmra.mxu1 %vm633_vm0, %v588_v15 }
  0x3b   : > { %1621 = vmatmul.msk.bf16.vlgmr.msrb.gmra.mxu2 %vm633_vm0, %v588_v15  ;;  %1630 = vmatmul.msk.bf16.vlgmr.msrb.gmra.mxu3 %vm633_vm0, %v588_v15 }
  0x49   : > { %1639 = vmatmul.msk.bf16.vlgmr.msra.gmra.mxu0 %vm633_vm0, %v588_v15  ;;  %1648 = vmatmul.msk.bf16.vlgmr.msra.gmra.mxu1 %vm633_vm0, %v588_v15 }
  0x4b   : > { %1657 = vmatmul.msk.bf16.vlgmr.msra.gmra.mxu2 %vm633_vm0, %v588_v15  ;;  %1666 = vmatmul.msk.bf16.vlgmr.msra.gmra.mxu3 %vm633_vm0, %v588_v15 }
  0xa6   : > { %v646_v26 = vpop.f32.mrf.mxu0  ;;  %v671_v27 = vpop.f32.mrf.mxu1 }
  0xa7   : > { %v672_v48 = vadd.f32 %v1780_v40, %v671_v27  ;;  %v647_v51 = vadd.f32 %v1779_v43, %v646_v26 }
  0xa9   : > { %v990_v56 = vpack.c.bf16 %v672_v48, %v672_v48  ;;  %v989_v61 = vpack.c.bf16 %v647_v51, %v647_v51 }
  0xae   : > { %v696_v28 = vpop.f32.mrf.mxu2  ;;  %v721_v29 = vpop.f32.mrf.mxu3 }
  0xaf   : > { %v648_v30 = vpop.f32.mrf.mxu0  ;;  %v673_v31 = vpop.f32.mrf.mxu1  ;;  %v697_v0 = vadd.f32 %v1781_v57, %v696_v28  ;;  %v722_v1 = vadd.f32 %v1782_v58, %v721_v29 }
  0xb0   : > { %v1791_v31 = vld [vmem:[%s584_s29] ss:$0 sm:$0xff]  ;;  %s1480_s29 = scalar_lea.hbm %s2350_s23, %s1706_s16 }
  0xb1   : > { %v991_v4 = vpack.c.bf16 %v697_v0, %v697_v0  ;;  %v992_v5 = vpack.c.bf16 %v722_v1, %v722_v1  ;;  %s1484_s0 = sshll.u32 %s1480_s29, 4  ;;  %s1485_s0 = int_to_ptr.hbm [resolvable:$true] %s1484_s0 }
  0xb2   : > { %s1835_s18 = sshra.s32 %s1485_s0, 4  ;;  %s1836_s18 = int_to_ptr.hbm [resolvable:$true] %s1835_s18 }
  0xb3   : > { %p1842_p0 = scmp.lt.s32.totalorder %s1836_s18, %s2350_s23 }
  0xb6   : > { %v698_v34 = vpop.f32.mrf.mxu2  ;;  %v723_v35 = vpop.f32.mrf.mxu3 }
  0xb7   : > { %v778_v36 = vpop.f32.mrf.mxu0  ;;  %v803_v37 = vpop.f32.mrf.mxu1 }
  0xb8   : > { %v779_v38 = vadd.f32 %v1783_v32, %v778_v36  ;;  %v804_v39 = vadd.f32 %v1784_v33, %v803_v37 }
  0xba   : > { %v993_v41 = vpack.c.bf16 %v779_v38, %v779_v38  ;;  %v994_v42 = vpack.c.bf16 %v804_v39, %v804_v39 }
  0xbc   : > { %v1005_v46 = vsel %vm1000_vm1, %v993_v41, 0  ;;  %v1024_v47 = vsel %vm1000_vm1, %v994_v42, 0 }
  0xbd   : > { %1014 = vmatpush.bf16.xpose.msrb.mxu0 %v1005_v46  ;;  %1033 = vmatpush.bf16.xpose.msrb.mxu1 %v1024_v47 }
  0xbe   : > { %v828_v49 = vpop.f32.mrf.mxu2  ;;  %v853_v50 = vpop.f32.mrf.mxu3 }
  0xbf   : > { %v829_v52 = vadd.f32 %v1785_v44, %v828_v49  ;;  %v854_v53 = vadd.f32 %v1786_v45, %v853_v50  ;;  %v780_v54 = vpop.f32.mrf.mxu0  ;;  %v805_v55 = vpop.f32.mrf.mxu1 }
  0xc1   : > { %v995_v59 = vpack.c.bf16 %v829_v52, %v829_v52  ;;  %v996_v60 = vpack.c.bf16 %v854_v53, %v854_v53 }
  0xc3   : > { %v1043_v62 = vsel %vm1000_vm1, %v995_v59, 0  ;;  %v1062_v63 = vsel %vm1000_vm1, %v996_v60, 0 }
  0xc4   : > { %1052 = vmatpush.bf16.xpose.msrb.mxu2 %v1043_v62  ;;  %1071 = vmatpush.bf16.xpose.msrb.mxu3 %v1062_v63 }
  0xc5   : > { %1667 = vmatmul.msk.bf16.vlgmr.msrb.gmra.mxu0 %vm1000_vm1, %v989_v61  ;;  %1668 = vmatmul.msk.bf16.vlgmr.msrb.gmra.mxu1 %vm1000_vm1, %v990_v56 }
  0xc6   : > { %v830_v2 = vpop.f32.mrf.mxu2  ;;  %v855_v3 = vpop.f32.mrf.mxu3 }
  0xc7   : > { %v910_v8 = vpop.f32.mrf.mxu0  ;;  %v935_v9 = vpop.f32.mrf.mxu1 }
  0xc8   : > { %v911_v10 = vadd.f32 %v1787_v6, %v910_v8  ;;  %v936_v11 = vadd.f32 %v1788_v7, %v935_v9 }
  0xca   : > { %v1125_v14 = vpack.c.bf16 %v911_v10, %v911_v10  ;;  %v1126_v15 = vpack.c.bf16 %v936_v11, %v936_v11 }
  0xcb   : > { %1669 = vmatmul.msk.bf16.vlgmr.msrb.gmra.mxu2 %vm1000_vm1, %v991_v4  ;;  %1670 = vmatmul.msk.bf16.vlgmr.msrb.gmra.mxu3 %vm1000_vm1, %v992_v5 }
  0xcc   : > { %v1134_v17 = vsel %vm1132_vm2, %v1125_v14, 0  ;;  %v1153_v18 = vsel %vm1132_vm2, %v1126_v15, 0 }
  0xcd   : > { %1143 = vmatpush.bf16.msra.mxu0 %v1134_v17  ;;  %1162 = vmatpush.bf16.msra.mxu1 %v1153_v18 }
  0xce   : > { %v960_v16 = vpop.f32.mrf.mxu2  ;;  %v985_v25 = vpop.f32.mrf.mxu3 }
  0xcf   : > { %v961_v19 = vadd.f32 %v1789_v13, %v960_v16  ;;  %v912_v21 = vpop.f32.mrf.mxu0  ;;  %v937_v22 = vpop.f32.mrf.mxu1  ;;  %v986_v27 = vadd.f32 %v1790_v24, %v985_v25  ;;  %v1212_v25 = vld [vmem:[%s2304_s8 + $0x8] sm:$0xf] }
  0xd0   : > { %v1210_v21 = vld [vmem:[%s2304_s8] sm:$0xf] }
  0xd1   : > { %v1127_v20 = vpack.c.bf16 %v961_v19, %v961_v19  ;;  %v1128_v28 = vpack.c.bf16 %v986_v27, %v986_v27  ;;  %v1218_v22 = vsel %vm1132_vm2, %v1210_v21, 0  ;;  %v1213_v27 = vld [vmem:[%s2304_s8 + $0xc] sm:$0xf]  ;;  %v1793_v21 = vld [vmem:[%s2306_s10] ss:$0 sm:$0xff] }
  0xd2   : > { %1227 = vmatpush.bf16.msrb.mxu0 %v1218_v22 }
  0xd3   : > { %v1172_v23 = vsel %vm1132_vm2, %v1127_v20, 0  ;;  %v1191_v29 = vsel %vm1132_vm2, %v1128_v28, 0  ;;  %v1275_v28 = vsel %vm1132_vm2, %v1213_v27, 0 }
  0xd4   : > { %1181 = vmatpush.bf16.msra.mxu2 %v1172_v23  ;;  %1200 = vmatpush.bf16.msra.mxu3 %v1191_v29  ;;  %v1211_v23 = vld [vmem:[%s2304_s8 + $0x4] sm:$0xf] }
  0xd5   : > { %v1237_v24 = vsel %vm1132_vm2, %v1211_v23, 0  ;;  %v1794_v23 = vld [vmem:[%s2307_s11] ss:$0 sm:$0xff] }
  0xd6   : > { %v962_v26 = vpop.f32.mrf.mxu2  ;;  %v987_v30 = vpop.f32.mrf.mxu3  ;;  %1246 = vmatpush.bf16.msrb.mxu1 %v1237_v24 }
  0xd7   : > { %v1256_v26 = vsel %vm1132_vm2, %v1212_v25, 0 }
  0xd8   : > { %1265 = vmatpush.bf16.msrb.mxu2 %v1256_v26  ;;  %1284 = vmatpush.bf16.msrb.mxu3 %v1275_v28  ;;  %v1736_v28 = vld [vmem:[%s2310_s14 + $0x8] sm:$0xff] }
 0x142   : > { %v1016_v32 = vpop.f32.mrf.mxu0  ;;  %v1035_v33 = vpop.f32.mrf.mxu1 }
 0x143   : > { %v1017_v34 = vadd.f32 %v1791_v31, %v1016_v32  ;;  %v1036_v36 = vadd.f32 %v1791_v31, %v1035_v33 }
 0x145   : > { %v1077_v35 = vsel %vm1000_vm1, %v1017_v34, -inf  ;;  %v1080_v39 = vsel %vm1000_vm1, %v1036_v36, -inf }
 0x146   : > { %1078 = vmax.xlane.f32.xlu1 %v1077_v35 }
 0x14a   : > { %v1018_v37 = vpop.f32.mrf.mxu0  ;;  %v1037_v38 = vpop.f32.mrf.mxu1 }
 0x14e   : > { %v1054_v40 = vpop.f32.mrf.mxu2  ;;  %v1073_v41 = vpop.f32.mrf.mxu3  ;;  %1081 = vmax.xlane.f32.xlu1 %v1080_v39 }
 0x14f   : > { %v1055_v42 = vadd.f32 %v1791_v31, %v1054_v40  ;;  %v1074_v44 = vadd.f32 %v1791_v31, %v1073_v41 }
 0x151   : > { %v1083_v43 = vsel %vm1000_vm1, %v1055_v42, -inf  ;;  %v1086_v47 = vsel %vm1000_vm1, %v1074_v44, -inf }
 0x152   : > { %1084 = vmax.xlane.f32.xlu0 %v1083_v43 }
 0x156   : > { %v1056_v45 = vpop.f32.mrf.mxu2  ;;  %v1075_v46 = vpop.f32.mrf.mxu3 }
 0x15a   : > { %1087 = vmax.xlane.f32.xlu0 %v1086_v47 }
 0x1b9   : > { %v1079_v48 = vpop.xlane.xlu1 %1078 }
 0x1ba   : > { %v1089_v49 = vsub.f32 %v1017_v34, %v1079_v48 }
 0x1bc   : > { %v1093_v50 = vmul.f32 1.442695, %v1089_v49 }
 0x1be   : > { %1799 = vpow2.f32 %v1093_v50 }
 0x1c1   : > { %v1082_v51 = vpop.xlane.xlu1 %1081 }
 0x1c2   : > { %v1090_v52 = vsub.f32 %v1036_v36, %v1082_v51 }
 0x1c4   : > { %v1800_v53 = vpop.eup %1799  ;;  %v1095_v54 = vmul.f32 1.442695, %v1090_v52 }
 0x1c5   : > { %v1085_v55 = vpop.xlane.xlu0 %1084  ;;  %v1101_v56 = vsel %vm1000_vm1, %v1800_v53, 0.0 }
 0x1c6   : > { %1801 = vpow2.f32 %v1095_v54  ;;  %v1091_v57 = vsub.f32 %v1055_v42, %v1085_v55  ;;  %1102 = vadd.xlane.f32.xlu0 %v1101_v56 }
 0x1c8   : > { %v1097_v58 = vmul.f32 1.442695, %v1091_v57 }
 0x1ca   : > { %1803 = vpow2.f32 %v1097_v58 }
 0x1cc   : > { %v1802_v59 = vpop.eup %1801 }
 0x1cd   : > { %v1088_v60 = vpop.xlane.xlu0 %1087  ;;  %v1104_v61 = vsel %vm1000_vm1, %v1802_v59, 0.0 }
 0x1ce   : > { %v1092_v62 = vsub.f32 %v1074_v44, %v1088_v60  ;;  %1105 = vadd.xlane.f32.xlu1 %v1104_v61  ;;  %v1885_v60 = vmov 32.0  }
 0x1d0   : > { %v1804_v63 = vpop.eup %1803  ;;  %v1099_v0 = vmul.f32 1.442695, %v1092_v62 }
 0x1d1   : > { %v1107_v1 = vsel %vm1000_vm1, %v1804_v63, 0.0 }
 0x1d2   : > { %1805 = vpow2.f32 %v1099_v0  ;;  %1108 = vadd.xlane.f32.xlu2 %v1107_v1 }
 0x1d8   : > { %v1806_v2 = vpop.eup %1805 }
 0x1d9   : > { %v1110_v3 = vsel %vm1000_vm1, %v1806_v2, 0.0 }
 0x1da   : > { %1111 = vadd.xlane.f32.xlu2 %v1110_v3 }
 0x239   : > { %v1103_v4 = vpop.xlane.xlu0 %1102 }
 0x23a   : > { %1807 = vrcp.f32 %v1103_v4 }
 0x240   : > { %v1808_v5 = vpop.eup %1807 }
 0x241   : > { %v1117_v6 = vmul.f32 %v1808_v5, %v1800_v53  ;;  %v1106_v7 = vpop.xlane.xlu1 %1105  ;;  %v1792_v53 = vld [vmem:[%s2305_s9] ss:$0 sm:$0xff] }
 0x242   : > { %1809 = vrcp.f32 %v1106_v7 }
 0x243   : > { %v1121_v8 = vpack.c.bf16 %v1117_v6, %v1117_v6 }
 0x245   : > { %v1109_v9 = vpop.xlane.xlu2 %1108  ;;  %1671 = vmatmul.msk.bf16.vlgmr.msra.gmra.mxu0 %vm1000_vm1, %v1121_v8  ;;  %v1733_v8 = vld [vmem:[%s2308_s12] sm:$0xff] }
 0x246   : > { %1811 = vrcp.f32 %v1109_v9  ;;  %v1738_v9 = vld [vmem:[%s2310_s14 + $0x18] sm:$0xff] }
 0x248   : > { %v1810_v10 = vpop.eup %1809 }
 0x249   : > { %v1118_v11 = vmul.f32 %v1810_v10, %v1802_v59 }
 0x24b   : > { %v1122_v13 = vpack.c.bf16 %v1118_v11, %v1118_v11 }
 0x24c   : > { %v1812_v14 = vpop.eup %1811 }
 0x24d   : > { %v1119_v15 = vmul.f32 %v1812_v14, %v1804_v63  ;;  %v1112_v16 = vpop.xlane.xlu2 %1111  ;;  %1672 = vmatmul.msk.bf16.vlgmr.msra.gmra.mxu1 %vm1000_vm1, %v1122_v13  ;;  %v1737_v13 = vld [vmem:[%s2310_s14 + $0x10] sm:$0xff] }
 0x24e   : > { %1813 = vrcp.f32 %v1112_v16  ;;  %1425 = vmatpush.bf16.msra.mxu1 %v1738_v9 }
 0x24f   : > { %v1123_v17 = vpack.c.bf16 %v1119_v15, %v1119_v15  ;;  %1815 = vrcp.f32 %v1885_v60 }
 0x251   : > { %1673 = vmatmul.msk.bf16.vlgmr.msra.gmra.mxu2 %vm1000_vm1, %v1123_v17 }
 0x252   : > { %1426 = vmatpush.bf16.msra.mxu1 %v1737_v13 }
 0x254   : > { %v1814_v18 = vpop.eup %1813 }
 0x255   : > { %v1120_v19 = vmul.f32 %v1814_v18, %v1806_v2  ;;  %v1816_v61 = vpop.eup %1815 }
 0x256   : > { %v1309_v62 = vmul.f32 32.0, %v1816_v61  ;;  %vm1313_vm3 = vweird.f32 %v1816_v61  ;;  %1427 = vmatpush.bf16.msra.mxu1 %v1736_v28 }
 0x257   : > { %v1124_v20 = vpack.c.bf16 %v1120_v19, %v1120_v19 }
 0x258   : > { %v1310_v63 = vsub.f32 1.0, %v1309_v62 }
 0x259   : > { %1674 = vmatmul.msk.bf16.vlgmr.msra.gmra.mxu3 %vm1000_vm1, %v1124_v20 }
 0x25a   : > { %v1311_v0 = vmul.f32 %v1816_v61, %v1310_v63 }
 0x25c   : > { %v1312_v1 = vadd.f32 %v1816_v61, %v1311_v0 }
 0x25e   : > { %v1314_v2 = vsel %vm1313_vm3, %v1816_v61, %v1312_v1 }
 0x2c2   : > { %v1145_v29 = vpop.f32.mrf.mxu0 }
 0x2c3   : > { %v1206_v30 = vpack.c.bf16 %v1145_v29, %v1145_v29  ;;  %v1735_v29 = vld [vmem:[%s2310_s14] sm:$0xff] }
 0x2c4   : > { %1428 = vmatpush.bf16.msra.mxu1 %v1735_v29 }
 0x2c5   : > { %1675 = vmatmul.msk.bf16.vlgmr.msrb.gmra.mxu0 %vm1000_vm1, %v1206_v30  ;;  %v1795_v30 = vld [vmem:[%s2309_s13] ss:$0 sm:$0xff] }
 0x2ca   : > { %v1147_v31 = vpop.f32.mrf.mxu0  ;;  %v1164_v32 = vpop.f32.mrf.mxu1 }
 0x2cb   : > { %v1207_v33 = vpack.c.bf16 %v1164_v32, %v1164_v32 }
 0x2cd   : > { %1676 = vmatmul.msk.bf16.vlgmr.msrb.gmra.mxu1 %vm1000_vm1, %v1207_v33 }
 0x2d2   : > { %v1166_v34 = vpop.f32.mrf.mxu1 }
 0x2d4   : > { %v1183_v35 = vpop.f32.mrf.mxu2 }
 0x2d5   : > { %v1208_v36 = vpack.c.bf16 %v1183_v35, %v1183_v35 }
 0x2d7   : > { %1677 = vmatmul.msk.bf16.vlgmr.msrb.gmra.mxu2 %vm1000_vm1, %v1208_v36  ;;  %v1796_v36 = vld [vmem:[%s2311_s15] ss:$0 sm:$0xff] }
 0x2dc   : > { %v1185_v37 = vpop.f32.mrf.mxu2  ;;  %v1202_v38 = vpop.f32.mrf.mxu3 }
 0x2dd   : > { %v1209_v39 = vpack.c.bf16 %v1202_v38, %v1202_v38 }
 0x2df   : > { %1678 = vmatmul.msk.bf16.vlgmr.msrb.gmra.mxu3 %vm1000_vm1, %v1209_v39 }
 0x2e4   : > { %v1204_v40 = vpop.f32.mrf.mxu3 }
 0x342   : > { %v1229_v41 = vpop.f32.mrf.mxu0 }
 0x343   : > { %v1290_v47 = vsel %vm633_vm0, %v1229_v41, 0.0 }
 0x34a   : > { %v1231_v42 = vpop.f32.mrf.mxu0  ;;  %v1248_v43 = vpop.f32.mrf.mxu1 }
 0x34b   : > { %v1291_v46 = vsel %vm633_vm0, %v1248_v43, 0.0 }
 0x34c   : > { %v1292_v49 = vadd.f32 %v1291_v46, %v1290_v47 }
 0x352   : > { %v1250_v44 = vpop.f32.mrf.mxu1 }
 0x35a   : > { %v1267_v45 = vpop.f32.mrf.mxu2 }
 0x35b   : > { %v1293_v48 = vsel %vm633_vm0, %v1267_v45, 0.0 }
 0x35c   : > { %v1294_v50 = vadd.f32 %v1293_v48, %v1292_v49 }
 0x362   : > { %v1269_v51 = vpop.f32.mrf.mxu2  ;;  %v1286_v52 = vpop.f32.mrf.mxu3 }
 0x363   : > { %v1295_v54 = vsel %vm633_vm0, %v1286_v52, 0.0 }
 0x364   : > { %v1296_v55 = vadd.f32 %v1295_v54, %v1294_v50 }
 0x366   : > { %v1301_v56 = vadd.f32 %v1792_v53, %v1296_v55 }
 0x368   : > { %v1302_v57 = vadd.f32 %v1301_v56, %v2073_v12  ;;  %v1734_v12 = vld [vmem:[%s2308_s12 + $0x8] sm:$0xff]  ;;  %v1797_v56 = vld [vmem:[%s2348_s2] ss:$0 sm:$0xff]  ;;  %s1837_s2 = scalar_lea.hbm %s1836_s18, 8 }
 0x369   : > { %1372 = vmatpush.bf16.msra.mxu0 %v1734_v12  ;;  %p1838_p11 = scmp.ne.s32.totalorder %s1836_s18, %s1837_s2  ;;  %p1843_p1 = scmp.lt.s32.totalorder %s1841_s30, %s1837_s2 }
 0x36a   : > { %v1288_v58 = vpop.f32.mrf.mxu3  ;;  %v1305_v59 = vsel %vm633_vm0, %v1302_v57, 0.0 }
 0x36b   : > { %1306 = vadd.xlane.f32.xlu2 %v1305_v59  ;;  %v1798_v59 = vld [vmem:[%s2349_s25] ss:$0 sm:$0xff]  ;;  %p1839_p12 = pnand %p1838_p11, %p2019_p5  ;;  %p1844_p2 = por %p1843_p1, %p1842_p0 }
 0x36d   : > { %1373 = vmatpush.bf16.msra.mxu0 %v1733_v8  ;;  %p1840_p13 = pneg %p1839_p12 }
 0x36f   : > { %p1845_p3 = pnand %p1844_p2, %p1840_p13 }
 0x3de   : > { %v1307_v3 = vpop.xlane.xlu2 %1306 }
 0x3df   : > { %v1315_v4 = vmul.f32 %v1314_v2, %v1307_v3 }
 0x3e1   : > { %v1316_v5 = vsub.f32 %v1302_v57, %v1315_v4 }
 0x3e3   : > { %v1317_v6 = vmul.f32 %v1316_v5, %v1316_v5 }
 0x3e5   : > { %v1318_v7 = vsel %vm633_vm0, %v1317_v6, 0.0 }
 0x3e6   : > { %1319 = vadd.xlane.f32.xlu0 %v1318_v7 }
 0x459   : > { %v1320_v10 = vpop.xlane.xlu0 %1319 }
 0x45a   : > { %v1321_v11 = vmul.f32 %v1320_v10, %v1314_v2 }
 0x45c   : > { %v1322_v14 = vadd.f32 1e-06, %v1321_v11 }
 0x45e   : > { %1817 = vrsqrt.f32 %v1322_v14  ;;  %vm1329_vm5 = vweird.f32 %v1322_v14 }
 0x464   : > { %v1818_v15 = vpop.eup %1817 }
 0x465   : > { %v1324_v16 = vmul.f32 %v1818_v15, %v1322_v14  ;;  %vm1330_vm4 = vweird.f32 %v1818_v15 }
 0x466   : > { %vm1331_vm6 = vmor %vm1329_vm5, %vm1330_vm4 }
 0x467   : > { %v1325_v17 = vmul.f32 %v1818_v15, %v1324_v16 }
 0x469   : > { %v1326_v18 = vmul.f32 0.5, %v1325_v17 }
 0x46b   : > { %v1327_v19 = vsub.f32 1.5, %v1326_v18 }
 0x46d   : > { %v1328_v20 = vmul.f32 %v1818_v15, %v1327_v19 }
 0x46f   : > { %v1332_v22 = vsel %vm1331_vm6, %v1818_v15, %v1328_v20 }
 0x470   : > { %v1333_v24 = vmul.f32 %v1332_v22, %v1316_v5 }
 0x472   : > { %v1337_v25 = vmul.f32 %v1793_v21, %v1333_v24 }
 0x474   : > { %v1341_v26 = vadd.f32 %v1794_v23, %v1337_v25 }
 0x476   : > { %v1342_v27 = vpack.c.bf16 %v1341_v26, %v1341_v26 }
 0x478   : > { %1687 = vmatmul.msk.bf16.vlgmr.msra.gmra.mxu0 %vm633_vm0, %v1342_v27 }
 0x4f5   : > { %v1375_v31 = vpop.f32.mrf.mxu0 }
 0x4f6   : > { %v1376_v32 = vadd.f32 %v1795_v30, %v1375_v31 }
 0x4f8   : > { %v1379_v33 = vmax.f32 %v1376_v32, 0.0 }
 0x4fa   : > { %v1380_v34 = vpack.c.bf16 %v1379_v33, %v1379_v33 }
 0x4fc   : > { %1704 = vmatmul.msk.bf16.vlgmr.msra.gmra.mxu1 %vm1417_vm7, %v1380_v34 }
 0x4fd   : > { %v1377_v35 = vpop.f32.mrf.mxu0 }
 0x579   : > { %v1430_v37 = vpop.f32.mrf.mxu1 }
 0x57a   : > { %v1431_v38 = vadd.f32 %v1796_v36, %v1430_v37 }
 0x57c   : > { %v1434_v39 = vadd.f32 %v1431_v38, %v1341_v26 }
 0x57e   : > { %v1437_v40 = vsel %vm633_vm0, %v1434_v39, 0.0 }
 0x57f   : > { %1438 = vadd.xlane.f32.xlu1 %v1437_v40 }
 0x581   : > { %v1432_v41 = vpop.f32.mrf.mxu1 }
 0x5f2   : > { %v1439_v42 = vpop.xlane.xlu1 %1438 }
 0x5f3   : > { %v1440_v43 = vmul.f32 %v1439_v42, %v1314_v2 }
 0x5f5   : > { %v1441_v44 = vsub.f32 %v1434_v39, %v1440_v43 }
 0x5f7   : > { %v1442_v45 = vmul.f32 %v1441_v44, %v1441_v44 }
 0x5f9   : > { %v1443_v46 = vsel %vm633_vm0, %v1442_v45, 0.0 }
 0x5fa   : > { %1444 = vadd.xlane.f32.xlu2 %v1443_v46 }
 0x66d   : > { %v1445_v47 = vpop.xlane.xlu2 %1444 }
 0x66e   : > { %v1446_v48 = vmul.f32 %v1445_v47, %v1314_v2 }
 0x670   : > { %v1447_v49 = vadd.f32 1e-06, %v1446_v48 }
 0x672   : > { %1819 = vrsqrt.f32 %v1447_v49  ;;  %vm1454_vm9 = vweird.f32 %v1447_v49 }
 0x678   : > { %v1820_v50 = vpop.eup %1819 }
 0x679   : > { %v1449_v51 = vmul.f32 %v1820_v50, %v1447_v49  ;;  %vm1455_vm8 = vweird.f32 %v1820_v50 }
 0x67a   : > { %vm1456_vm10 = vmor %vm1454_vm9, %vm1455_vm8 }
 0x67b   : > { %v1450_v52 = vmul.f32 %v1820_v50, %v1449_v51 }
 0x67d   : > { %v1451_v53 = vmul.f32 0.5, %v1450_v52 }
 0x67f   : > { %v1452_v54 = vsub.f32 1.5, %v1451_v53 }
 0x681   : > { %v1453_v55 = vmul.f32 %v1820_v50, %v1452_v54 }
 0x683   : > { %v1457_v57 = vsel %vm1456_vm10, %v1820_v50, %v1453_v55 }
 0x684   : > { %v1458_v58 = vmul.f32 %v1457_v57, %v1441_v44 }
 0x686   : > { %v1462_v60 = vmul.f32 %v1797_v56, %v1458_v58 }
 0x688   : > { %v1466_v61 = vadd.f32 %v1798_v59, %v1462_v60 }
 0x68a   : > { %v1467_v62 = vmax.f32 %v1466_v61, 0.0 }
 0x68c   : > { %1468 = vst.msk [vmem:[%s577_s3] sm:$0xff] %vm633_vm0, %v1467_v62 }
 0x68d   : > { %1848 = shalt.err (!%p1845_p3)
}
 0x68e   : > { %1739 = dma.vmem_to_hbm [thread:$0]  (%p2019_p5), %s1483_s4, 128, %s1485_s0, %s1470_s17  }
 0x68f PF: > { %s2352_s3 = sld [smem:[#allocation7_spill]] }
 0x690   : > { %s2353_s24 = sld [smem:[#allocation5_spill]] }
 0x695   : > { %p1745_p4 = scmp.ge.s32.totalorder %s2352_s3, 2 }
 0x696   : > { %s1496_s1 = sand.u32 1, %s2353_s24  }
 0x697   : > { %p1742_p7 = pnand %p1745_p4, %p2023_p6  ;;  %s1497_s29 = scalar_lea.sflag [#allocation3], %s1496_s1 }
 0x699   : > { %p1743_p8 = pneg %p1742_p7 }
 0x69b   : > { %1866 = dma.done.wait (%p1743_p8), %s1497_s29, 128  }
 0x69c   : > { %1868 = vsyncadd (%p1743_p8), %s1497_s29, 4294967168  ;;  %s2355_s30 = sld [smem:[#allocation8_spill]]  ;;  %s2358_s27 = smov %s1875_s28 }
 0x69d   : > { %s2356_s18 = sld [smem:[#allocation6_spill]] }
 0x69e   : > { %s2357_s29 = sld [smem:[#allocation9_spill]] }
 0x6a2   : > { %p28_p9 = scmp.ge.s32.totalorder %s2355_s30, 4  }
 0x6a3   : > { %s2359_s28 = smov %s2356_s18 }
 0x6a4   :  { %30 = sbr.rel (!%p28_p9) target bundleno = 12 (0xc), region = 130 }
 0x6a9   :  { %1503 = vsyncpa [#allocation3], 1 }
 0x6aa   :  { %1505 = vsyncpa [#allocation3 + $0x1], 1 }

</bundles_post_ra>
